<compile_context>
chip_gen: v6e
topology: v6e:2x2x1
jax: 0.10.0
libtpu: 0.0.40
codegen_flags: <defaults>
</compile_context>

<pallas_src>
import jax
import jax.numpy as jnp
from jax import lax
from jax.experimental import pallas as pl
from jax.experimental.pallas import tpu as pltpu


def _decoder_kernel(x_ref,                       # (B, L)            VMEM
                    wih1_ref, whh1_ref, b1_ref,  # (L,4H),(H,4H),(1,4H)  [i|f|o|g]
                    w2_ref, b2_ref,              # (H+E,4E),(1,4E)       [i|f|o|g]
                    wfc_ref, bfc_ref,            # (E, E) pre-transposed, (1, E)
                    gamma_ref, beta_ref,         # (T,), (T,)         SMEM scalars
                    out_ref):                    # (B, T*E)           VMEM, lane-dense
    B = x_ref.shape[0]
    H = whh1_ref.shape[0]
    E = wfc_ref.shape[0]
    T = gamma_ref.shape[0]
    eps = 1e-5

    # ---- loop-invariant loads (hoisted; JAX does not CSE these) ----
    whh1 = whh1_ref[...]                         # (H, 4H)
    w2 = w2_ref[...]                             # (H+E, 4E)
    b2 = b2_ref[...]                             # (1, 4E)
    wfc = wfc_ref[...]                           # (E, E)
    bfc = bfc_ref[...]                           # (1, E)

    # Input is identical at every timestep -> input-to-hidden matmul done once.
    gx1 = jnp.dot(x_ref[...], wih1_ref[...],
                  preferred_element_type=jnp.float32) + b1_ref[...]   # (B, 4H)

    def lstm_cell(pre, c, hsz):
        # Gate columns packed [i, f, o, g]: one sigmoid over 3*hsz lanes,
        # one tanh over the last hsz lanes (2 EUP launches per cell).
        sig = jax.nn.sigmoid(pre[:, :3 * hsz])
        g = jnp.tanh(pre[:, 3 * hsz:])
        i = sig[:, 0:hsz]
        f = sig[:, hsz:2 * hsz]
        o = sig[:, 2 * hsz:3 * hsz]
        c_new = f * c + i * g
        h_new = o * jnp.tanh(c_new)
        return h_new, c_new

    h1 = jnp.zeros((B, H), jnp.float32)
    c1 = jnp.zeros((B, H), jnp.float32)
    h2 = jnp.zeros((B, E), jnp.float32)
    c2 = jnp.zeros((B, E), jnp.float32)

    pieces = []
    # Fully unrolled recurrence (T is a small static constant): static indices
    # everywhere, maximum scheduler visibility across adjacent steps.
    for t in range(T):
        # --- LSTM1 step: only the recurrent matmul remains per step ---
        pre1 = gx1 + jnp.dot(h1, whh1, preferred_element_type=jnp.float32)
        h1, c1 = lstm_cell(pre1, c1, H)

        # --- LSTM2 step: fused input+recurrent matmul (one MXU push) ---
        pre2 = jnp.dot(jnp.concatenate([h1, h2], axis=-1), w2,
                       preferred_element_type=jnp.float32) + b2
        h2, c2 = lstm_cell(pre2, c2, E)

        # --- fc + BatchNorm1d(T) for this token (off the recurrent path) ---
        y = jnp.dot(h2, wfc, preferred_element_type=jnp.float32) + bfc  # (B, E)
        m = jnp.mean(y, keepdims=True)                                  # (1, 1)
        v = jnp.mean((y - m) ** 2, keepdims=True)                       # biased var
        norm = (y - m) * lax.rsqrt(v + eps)
        pieces.append(norm * gamma_ref[t] + beta_ref[t])                # (B, E)

    # Single lane-dense store: (B, T*E); column block t == token t.
    out_ref[...] = jnp.concatenate(pieces, axis=-1)


def _reorder_gates_cols(w):
    """Columns packed [i|f|g|o] (PyTorch order) -> [i|f|o|g]."""
    i, f, g, o = jnp.split(w, 4, axis=-1)
    return jnp.concatenate([i, f, o, g], axis=-1)


def decoder_forward(x, params, number_of_tokens):
    """x: (B, L) latent.  Returns (B, T, E), matching the PyTorch forward."""
    B, L = x.shape
    H = params["whh1"].shape[1]      # weights kept in PyTorch (out, in) convention
    E = params["whh2"].shape[1]
    T = number_of_tokens

    # Pre-transpose to (in, 4*out), reorder gate columns to [i, f, o, g], and
    # fuse LSTM2's input + recurrent weights into a single (H+E, 4E) matrix.
    wih1 = _reorder_gates_cols(params["wih1"].T)                      # (L, 4H)
    whh1 = _reorder_gates_cols(params["whh1"].T)                      # (H, 4H)
    b1 = _reorder_gates_cols(params["b1"])                            # (1, 4H)
    w2 = _reorder_gates_cols(
        jnp.concatenate([params["wih2"].T, params["whh2"].T], axis=0))  # (H+E, 4E)
    b2 = _reorder_gates_cols(params["b2"])                            # (1, 4E)
    wfc = params["wfc"].T                                             # (E, E)
    bfc = params["bfc"]                                               # (1, E)

    vmem = pl.BlockSpec(memory_space=pltpu.MemorySpace.VMEM)
    smem = pl.BlockSpec(memory_space=pltpu.MemorySpace.SMEM)

    out_flat = pl.pallas_call(
        _decoder_kernel,
        out_shape=jax.ShapeDtypeStruct((B, T * E), jnp.float32),
        in_specs=[vmem] * 8 + [smem, smem],
        out_specs=vmem,
    )(
        x,
        wih1, whh1, b1,
        w2, b2,
        wfc, bfc,
        params["gamma"].astype(jnp.float32),
        params["beta"].astype(jnp.float32),
    )
    # (B, T*E) row-major == (B, T, E) row-major: free reshape, no transpose.
    return out_flat.reshape(B, T, E)


def decoder_reference(x, params, T):
    """Pure-JAX reference mirroring the PyTorch module semantics."""
    B, _ = x.shape
    H = params["whh1"].shape[1]
    E = params["whh2"].shape[1]

    def cell(h, c, inp, wih, whh, b, hsz):
        pre = inp @ wih.T + h @ whh.T + b
        i = jax.nn.sigmoid(pre[:, :hsz])
        f = jax.nn.sigmoid(pre[:, hsz:2 * hsz])
        g = jnp.tanh(pre[:, 2 * hsz:3 * hsz])
        o = jax.nn.sigmoid(pre[:, 3 * hsz:])
        c = f * c + i * g
        h = o * jnp.tanh(c)
        return h, c

    def scan_fn(carry, _):
        h1, c1, h2, c2 = carry
        h1, c1 = cell(h1, c1, x, params["wih1"], params["whh1"], params["b1"][0], H)
        h2, c2 = cell(h2, c2, h1, params["wih2"], params["whh2"], params["b2"][0], E)
        return (h1, c1, h2, c2), h2

    init = (jnp.zeros((B, H), jnp.float32), jnp.zeros((B, H), jnp.float32),
            jnp.zeros((B, E), jnp.float32), jnp.zeros((B, E), jnp.float32))
    _, seq = lax.scan(scan_fn, init, None, length=T)             # (T, B, E)
    y = seq @ params["wfc"].T + params["bfc"][0]                 # (T, B, E)
    y = jnp.transpose(y, (1, 0, 2))                              # (B, T, E)
    mean = jnp.mean(y, axis=(0, 2), keepdims=True)
    var = jnp.mean((y - mean) ** 2, axis=(0, 2), keepdims=True)
    yhat = (y - mean) / jnp.sqrt(var + 1e-5)
    return yhat * params["gamma"].reshape(1, T, 1) + params["beta"].reshape(1, T, 1)


def make_params(key, T, L, E):
    """Deterministic synthetic parameters (PyTorch-convention shapes).

    b1/b2 are the fused LSTM biases (bias_ih + bias_hh).
    """
    H = 2 * L
    k = jax.random.split(key, 8)
    s1 = 1.0 / jnp.sqrt(H)
    s2 = 1.0 / jnp.sqrt(E)
    u = lambda kk, shape, s: jax.random.uniform(kk, shape, jnp.float32, -s, s)
    return {
        # LSTM1: input L -> hidden H
        "wih1": u(k[0], (4 * H, L), s1),
        "whh1": u(k[1], (4 * H, H), s1),
        "b1":   u(k[2], (1, 4 * H), s1),
        # LSTM2: input H -> hidden E
        "wih2": u(k[3], (4 * E, H), s2),
        "whh2": u(k[4], (4 * E, E), s2),
        "b2":   u(k[5], (1, 4 * E), s2),
        # fc: E -> E
        "wfc":  u(k[6], (E, E), s2),
        "bfc":  u(k[7], (1, E), s2),
        # BatchNorm1d(T) default affine init
        "gamma": jnp.ones((T,), jnp.float32),
        "beta":  jnp.zeros((T,), jnp.float32),
    }


if __name__ == "__main__":
    # small shapes consistent with the module
    B = 2                     # batch
    T = 8                     # number_of_tokens_per_datapoint
    L = 16                    # size_latent_space
    E = 32                    # size_of_embeddings  (hidden of LSTM1 is 2*L = 32)

    key = jax.random.PRNGKey(0)
    kx, kp = jax.random.split(key)
    x = jax.random.normal(kx, (B, L), jnp.float32)
    params = make_params(kp, T, L, E)

    out = decoder_forward(x, params, T)
    out = jax.block_until_ready(out)

    ref = decoder_reference(x, params, T)
    assert out.shape == (B, T, E), out.shape
    assert jnp.allclose(out, ref, atol=1e-4, rtol=1e-4), float(jnp.max(jnp.abs(out - ref)))

    print("KERNEL_OK")
</pallas_src>

<mosaic_0001>
module attributes {stable_mosaic.version = 11 : i64} {
  func.func @_decoder_kernel(%arg0: memref<2x16xf32, #tpu.memory_space<vmem>>, %arg1: memref<16x128xf32, #tpu.memory_space<vmem>>, %arg2: memref<32x128xf32, #tpu.memory_space<vmem>>, %arg3: memref<1x128xf32, #tpu.memory_space<vmem>>, %arg4: memref<64x128xf32, #tpu.memory_space<vmem>>, %arg5: memref<1x128xf32, #tpu.memory_space<vmem>>, %arg6: memref<32x32xf32, #tpu.memory_space<vmem>>, %arg7: memref<1x32xf32, #tpu.memory_space<vmem>>, %arg8: memref<8xf32, #tpu.memory_space<smem>>, %arg9: memref<8xf32, #tpu.memory_space<smem>>, %arg10: memref<2x256xf32, #tpu.memory_space<vmem>>) attributes {dimension_semantics = [], scalar_prefetch = 0 : i64, scratch_operands = 0 : i64, tpu.core_type = #tpu.core_type<tc>} {
    %c0 = arith.constant 0 : index
    %c0_0 = arith.constant 0 : index
    %0 = vector.load %arg2[%c0, %c0_0] : memref<32x128xf32, #tpu.memory_space<vmem>>, vector<32x128xf32>
    %c0_1 = arith.constant 0 : index
    %c0_2 = arith.constant 0 : index
    %1 = vector.load %arg4[%c0_1, %c0_2] : memref<64x128xf32, #tpu.memory_space<vmem>>, vector<64x128xf32>
    %c0_3 = arith.constant 0 : index
    %c0_4 = arith.constant 0 : index
    %2 = vector.load %arg5[%c0_3, %c0_4] : memref<1x128xf32, #tpu.memory_space<vmem>>, vector<1x128xf32>
    %c0_5 = arith.constant 0 : index
    %c0_6 = arith.constant 0 : index
    %3 = vector.load %arg6[%c0_5, %c0_6] : memref<32x32xf32, #tpu.memory_space<vmem>>, vector<32x32xf32>
    %c0_7 = arith.constant 0 : index
    %c0_8 = arith.constant 0 : index
    %4 = vector.load %arg7[%c0_7, %c0_8] : memref<1x32xf32, #tpu.memory_space<vmem>>, vector<1x32xf32>
    %c0_9 = arith.constant 0 : index
    %c0_10 = arith.constant 0 : index
    %5 = vector.load %arg0[%c0_9, %c0_10] : memref<2x16xf32, #tpu.memory_space<vmem>>, vector<2x16xf32>
    %c0_11 = arith.constant 0 : index
    %c0_12 = arith.constant 0 : index
    %6 = vector.load %arg1[%c0_11, %c0_12] : memref<16x128xf32, #tpu.memory_space<vmem>>, vector<16x128xf32>
    %cst = arith.constant dense<0.000000e+00> : vector<2x128xf32>
    %7 = tpu.matmul %5, %6, %cst {dimension_numbers = #tpu.dot_dimension_numbers<[1], [0], [0], [1], [0, 0, 1, 1], [], []>} : vector<2x16xf32>, vector<16x128xf32>, vector<2x128xf32> -> vector<2x128xf32>
    %c0_13 = arith.constant 0 : index
    %c0_14 = arith.constant 0 : index
    %8 = vector.load %arg3[%c0_13, %c0_14] : memref<1x128xf32, #tpu.memory_space<vmem>>, vector<1x128xf32>
    %9 = vector.broadcast %8 : vector<1x128xf32> to vector<2x128xf32>
    %10 = arith.addf %7, %9 : vector<2x128xf32>
    %cst_15 = arith.constant 0.000000e+00 : f32
    %11 = vector.broadcast %cst_15 : f32 to vector<2x32xf32>
    %cst_16 = arith.constant 0.000000e+00 : f32
    %12 = vector.broadcast %cst_16 : f32 to vector<2x32xf32>
    %cst_17 = arith.constant 0.000000e+00 : f32
    %13 = vector.broadcast %cst_17 : f32 to vector<2x32xf32>
    %cst_18 = arith.constant 0.000000e+00 : f32
    %14 = vector.broadcast %cst_18 : f32 to vector<2x32xf32>
    %cst_19 = arith.constant dense<0.000000e+00> : vector<2x128xf32>
    %15 = tpu.matmul %11, %0, %cst_19 {dimension_numbers = #tpu.dot_dimension_numbers<[1], [0], [0], [1], [0, 0, 1, 1], [], []>} : vector<2x32xf32>, vector<32x128xf32>, vector<2x128xf32> -> vector<2x128xf32>
    %16 = arith.addf %10, %15 : vector<2x128xf32>
    %17 = vector.extract_strided_slice %16 {offsets = [0, 0], sizes = [2, 96], strides = [1, 1]} : vector<2x128xf32> to vector<2x96xf32>
    %18 = arith.negf %17 : vector<2x96xf32>
    %19 = math.exp %18 : vector<2x96xf32>
    %cst_20 = arith.constant 1.000000e+00 : f32
    %20 = vector.broadcast %cst_20 : f32 to vector<2x96xf32>
    %21 = arith.addf %20, %19 : vector<2x96xf32>
    %22 = arith.divf %20, %21 : vector<2x96xf32>
    %23 = vector.extract_strided_slice %16 {offsets = [0, 96], sizes = [2, 32], strides = [1, 1]} : vector<2x128xf32> to vector<2x32xf32>
    %24 = math.tanh %23 : vector<2x32xf32>
    %25 = vector.extract_strided_slice %22 {offsets = [0, 0], sizes = [2, 32], strides = [1, 1]} : vector<2x96xf32> to vector<2x32xf32>
    %26 = vector.extract_strided_slice %22 {offsets = [0, 32], sizes = [2, 32], strides = [1, 1]} : vector<2x96xf32> to vector<2x32xf32>
    %27 = vector.extract_strided_slice %22 {offsets = [0, 64], sizes = [2, 32], strides = [1, 1]} : vector<2x96xf32> to vector<2x32xf32>
    %28 = arith.mulf %26, %12 : vector<2x32xf32>
    %29 = arith.mulf %25, %24 : vector<2x32xf32>
    %30 = arith.addf %28, %29 : vector<2x32xf32>
    %31 = math.tanh %30 : vector<2x32xf32>
    %32 = arith.mulf %27, %31 : vector<2x32xf32>
    %33 = tpu.concatenate %32, %13 in 1 : vector<2x32xf32>, vector<2x32xf32> -> vector<2x64xf32>
    %cst_21 = arith.constant dense<0.000000e+00> : vector<2x128xf32>
    %34 = tpu.matmul %33, %1, %cst_21 {dimension_numbers = #tpu.dot_dimension_numbers<[1], [0], [0], [1], [0, 0, 1, 1], [], []>} : vector<2x64xf32>, vector<64x128xf32>, vector<2x128xf32> -> vector<2x128xf32>
    %35 = vector.broadcast %2 : vector<1x128xf32> to vector<2x128xf32>
    %36 = arith.addf %34, %35 : vector<2x128xf32>
    %37 = vector.extract_strided_slice %36 {offsets = [0, 0], sizes = [2, 96], strides = [1, 1]} : vector<2x128xf32> to vector<2x96xf32>
    %38 = arith.negf %37 : vector<2x96xf32>
    %39 = math.exp %38 : vector<2x96xf32>
    %cst_22 = arith.constant 1.000000e+00 : f32
    %40 = vector.broadcast %cst_22 : f32 to vector<2x96xf32>
    %41 = arith.addf %40, %39 : vector<2x96xf32>
    %42 = arith.divf %40, %41 : vector<2x96xf32>
    %43 = vector.extract_strided_slice %36 {offsets = [0, 96], sizes = [2, 32], strides = [1, 1]} : vector<2x128xf32> to vector<2x32xf32>
    %44 = math.tanh %43 : vector<2x32xf32>
    %45 = vector.extract_strided_slice %42 {offsets = [0, 0], sizes = [2, 32], strides = [1, 1]} : vector<2x96xf32> to vector<2x32xf32>
    %46 = vector.extract_strided_slice %42 {offsets = [0, 32], sizes = [2, 32], strides = [1, 1]} : vector<2x96xf32> to vector<2x32xf32>
    %47 = vector.extract_strided_slice %42 {offsets = [0, 64], sizes = [2, 32], strides = [1, 1]} : vector<2x96xf32> to vector<2x32xf32>
    %48 = arith.mulf %46, %14 : vector<2x32xf32>
    %49 = arith.mulf %45, %44 : vector<2x32xf32>
    %50 = arith.addf %48, %49 : vector<2x32xf32>
    %51 = math.tanh %50 : vector<2x32xf32>
    %52 = arith.mulf %47, %51 : vector<2x32xf32>
    %cst_23 = arith.constant dense<0.000000e+00> : vector<2x32xf32>
    %53 = tpu.matmul %52, %3, %cst_23 {dimension_numbers = #tpu.dot_dimension_numbers<[1], [0], [0], [1], [0, 0, 1, 1], [], []>} : vector<2x32xf32>, vector<32x32xf32>, vector<2x32xf32> -> vector<2x32xf32>
    %54 = vector.broadcast %4 : vector<1x32xf32> to vector<2x32xf32>
    %55 = arith.addf %53, %54 : vector<2x32xf32>
    %56 = vector.shape_cast %55 : vector<2x32xf32> to vector<1x2x32xf32>
    %cst_24 = arith.constant dense<0.000000e+00> : vector<1xf32>
    %57 = vector.multi_reduction <add>, %56, %cst_24 [1, 2] : vector<1x2x32xf32> to vector<1xf32>
    %58 = vector.shape_cast %57 : vector<1xf32> to vector<1x1x1xf32>
    %59 = vector.extract %58[0, 0, 0] : f32 from vector<1x1x1xf32>
    %60 = vector.broadcast %59 : f32 to vector<1x1xf32>
    %cst_25 = arith.constant 6.400000e+01 : f32
    %61 = vector.broadcast %cst_25 : f32 to vector<1x1xf32>
    %62 = arith.divf %60, %61 : vector<1x1xf32>
    %63 = vector.broadcast %62 : vector<1x1xf32> to vector<2x32xf32>
    %64 = arith.subf %55, %63 : vector<2x32xf32>
    %65 = arith.mulf %64, %64 : vector<2x32xf32>
    %66 = vector.shape_cast %65 : vector<2x32xf32> to vector<1x2x32xf32>
    %cst_26 = arith.constant dense<0.000000e+00> : vector<1xf32>
    %67 = vector.multi_reduction <add>, %66, %cst_26 [1, 2] : vector<1x2x32xf32> to vector<1xf32>
    %68 = vector.shape_cast %67 : vector<1xf32> to vector<1x1x1xf32>
    %69 = vector.extract %68[0, 0, 0] : f32 from vector<1x1x1xf32>
    %70 = vector.broadcast %69 : f32 to vector<1x1xf32>
    %cst_27 = arith.constant 6.400000e+01 : f32
    %71 = vector.broadcast %cst_27 : f32 to vector<1x1xf32>
    %72 = arith.divf %70, %71 : vector<1x1xf32>
    %73 = vector.broadcast %62 : vector<1x1xf32> to vector<2x32xf32>
    %74 = arith.subf %55, %73 : vector<2x32xf32>
    %cst_28 = arith.constant 9.99999974E-6 : f32
    %75 = vector.broadcast %cst_28 : f32 to vector<1x1xf32>
    %76 = arith.addf %72, %75 : vector<1x1xf32>
    %77 = math.rsqrt %76 : vector<1x1xf32>
    %78 = vector.broadcast %77 : vector<1x1xf32> to vector<2x32xf32>
    %79 = arith.mulf %74, %78 : vector<2x32xf32>
    %c0_29 = arith.constant 0 : index
    %80 = memref.load %arg8[%c0_29] : memref<8xf32, #tpu.memory_space<smem>>
    %81 = vector.broadcast %80 : f32 to vector<2x32xf32>
    %82 = arith.mulf %79, %81 : vector<2x32xf32>
    %c0_30 = arith.constant 0 : index
    %83 = memref.load %arg9[%c0_30] : memref<8xf32, #tpu.memory_space<smem>>
    %84 = vector.broadcast %83 : f32 to vector<2x32xf32>
    %85 = arith.addf %82, %84 : vector<2x32xf32>
    %cst_31 = arith.constant dense<0.000000e+00> : vector<2x128xf32>
    %86 = tpu.matmul %32, %0, %cst_31 {dimension_numbers = #tpu.dot_dimension_numbers<[1], [0], [0], [1], [0, 0, 1, 1], [], []>} : vector<2x32xf32>, vector<32x128xf32>, vector<2x128xf32> -> vector<2x128xf32>
    %87 = arith.addf %10, %86 : vector<2x128xf32>
    %88 = vector.extract_strided_slice %87 {offsets = [0, 0], sizes = [2, 96], strides = [1, 1]} : vector<2x128xf32> to vector<2x96xf32>
    %89 = arith.negf %88 : vector<2x96xf32>
    %90 = math.exp %89 : vector<2x96xf32>
    %cst_32 = arith.constant 1.000000e+00 : f32
    %91 = vector.broadcast %cst_32 : f32 to vector<2x96xf32>
    %92 = arith.addf %91, %90 : vector<2x96xf32>
    %93 = arith.divf %91, %92 : vector<2x96xf32>
    %94 = vector.extract_strided_slice %87 {offsets = [0, 96], sizes = [2, 32], strides = [1, 1]} : vector<2x128xf32> to vector<2x32xf32>
    %95 = math.tanh %94 : vector<2x32xf32>
    %96 = vector.extract_strided_slice %93 {offsets = [0, 0], sizes = [2, 32], strides = [1, 1]} : vector<2x96xf32> to vector<2x32xf32>
    %97 = vector.extract_strided_slice %93 {offsets = [0, 32], sizes = [2, 32], strides = [1, 1]} : vector<2x96xf32> to vector<2x32xf32>
    %98 = vector.extract_strided_slice %93 {offsets = [0, 64], sizes = [2, 32], strides = [1, 1]} : vector<2x96xf32> to vector<2x32xf32>
    %99 = arith.mulf %97, %30 : vector<2x32xf32>
    %100 = arith.mulf %96, %95 : vector<2x32xf32>
    %101 = arith.addf %99, %100 : vector<2x32xf32>
    %102 = math.tanh %101 : vector<2x32xf32>
    %103 = arith.mulf %98, %102 : vector<2x32xf32>
    %104 = tpu.concatenate %103, %52 in 1 : vector<2x32xf32>, vector<2x32xf32> -> vector<2x64xf32>
    %cst_33 = arith.constant dense<0.000000e+00> : vector<2x128xf32>
    %105 = tpu.matmul %104, %1, %cst_33 {dimension_numbers = #tpu.dot_dimension_numbers<[1], [0], [0], [1], [0, 0, 1, 1], [], []>} : vector<2x64xf32>, vector<64x128xf32>, vector<2x128xf32> -> vector<2x128xf32>
    %106 = vector.broadcast %2 : vector<1x128xf32> to vector<2x128xf32>
    %107 = arith.addf %105, %106 : vector<2x128xf32>
    %108 = vector.extract_strided_slice %107 {offsets = [0, 0], sizes = [2, 96], strides = [1, 1]} : vector<2x128xf32> to vector<2x96xf32>
    %109 = arith.negf %108 : vector<2x96xf32>
    %110 = math.exp %109 : vector<2x96xf32>
    %cst_34 = arith.constant 1.000000e+00 : f32
    %111 = vector.broadcast %cst_34 : f32 to vector<2x96xf32>
    %112 = arith.addf %111, %110 : vector<2x96xf32>
    %113 = arith.divf %111, %112 : vector<2x96xf32>
    %114 = vector.extract_strided_slice %107 {offsets = [0, 96], sizes = [2, 32], strides = [1, 1]} : vector<2x128xf32> to vector<2x32xf32>
    %115 = math.tanh %114 : vector<2x32xf32>
    %116 = vector.extract_strided_slice %113 {offsets = [0, 0], sizes = [2, 32], strides = [1, 1]} : vector<2x96xf32> to vector<2x32xf32>
    %117 = vector.extract_strided_slice %113 {offsets = [0, 32], sizes = [2, 32], strides = [1, 1]} : vector<2x96xf32> to vector<2x32xf32>
    %118 = vector.extract_strided_slice %113 {offsets = [0, 64], sizes = [2, 32], strides = [1, 1]} : vector<2x96xf32> to vector<2x32xf32>
    %119 = arith.mulf %117, %50 : vector<2x32xf32>
    %120 = arith.mulf %116, %115 : vector<2x32xf32>
    %121 = arith.addf %119, %120 : vector<2x32xf32>
    %122 = math.tanh %121 : vector<2x32xf32>
    %123 = arith.mulf %118, %122 : vector<2x32xf32>
    %cst_35 = arith.constant dense<0.000000e+00> : vector<2x32xf32>
    %124 = tpu.matmul %123, %3, %cst_35 {dimension_numbers = #tpu.dot_dimension_numbers<[1], [0], [0], [1], [0, 0, 1, 1], [], []>} : vector<2x32xf32>, vector<32x32xf32>, vector<2x32xf32> -> vector<2x32xf32>
    %125 = vector.broadcast %4 : vector<1x32xf32> to vector<2x32xf32>
    %126 = arith.addf %124, %125 : vector<2x32xf32>
    %127 = vector.shape_cast %126 : vector<2x32xf32> to vector<1x2x32xf32>
    %cst_36 = arith.constant dense<0.000000e+00> : vector<1xf32>
    %128 = vector.multi_reduction <add>, %127, %cst_36 [1, 2] : vector<1x2x32xf32> to vector<1xf32>
    %129 = vector.shape_cast %128 : vector<1xf32> to vector<1x1x1xf32>
    %130 = vector.extract %129[0, 0, 0] : f32 from vector<1x1x1xf32>
    %131 = vector.broadcast %130 : f32 to vector<1x1xf32>
    %cst_37 = arith.constant 6.400000e+01 : f32
    %132 = vector.broadcast %cst_37 : f32 to vector<1x1xf32>
    %133 = arith.divf %131, %132 : vector<1x1xf32>
    %134 = vector.broadcast %133 : vector<1x1xf32> to vector<2x32xf32>
    %135 = arith.subf %126, %134 : vector<2x32xf32>
    %136 = arith.mulf %135, %135 : vector<2x32xf32>
    %137 = vector.shape_cast %136 : vector<2x32xf32> to vector<1x2x32xf32>
    %cst_38 = arith.constant dense<0.000000e+00> : vector<1xf32>
    %138 = vector.multi_reduction <add>, %137, %cst_38 [1, 2] : vector<1x2x32xf32> to vector<1xf32>
    %139 = vector.shape_cast %138 : vector<1xf32> to vector<1x1x1xf32>
    %140 = vector.extract %139[0, 0, 0] : f32 from vector<1x1x1xf32>
    %141 = vector.broadcast %140 : f32 to vector<1x1xf32>
    %cst_39 = arith.constant 6.400000e+01 : f32
    %142 = vector.broadcast %cst_39 : f32 to vector<1x1xf32>
    %143 = arith.divf %141, %142 : vector<1x1xf32>
    %144 = vector.broadcast %133 : vector<1x1xf32> to vector<2x32xf32>
    %145 = arith.subf %126, %144 : vector<2x32xf32>
    %cst_40 = arith.constant 9.99999974E-6 : f32
    %146 = vector.broadcast %cst_40 : f32 to vector<1x1xf32>
    %147 = arith.addf %143, %146 : vector<1x1xf32>
    %148 = math.rsqrt %147 : vector<1x1xf32>
    %149 = vector.broadcast %148 : vector<1x1xf32> to vector<2x32xf32>
    %150 = arith.mulf %145, %149 : vector<2x32xf32>
    %c1 = arith.constant 1 : index
    %151 = memref.load %arg8[%c1] : memref<8xf32, #tpu.memory_space<smem>>
    %152 = vector.broadcast %151 : f32 to vector<2x32xf32>
    %153 = arith.mulf %150, %152 : vector<2x32xf32>
    %c1_41 = arith.constant 1 : index
    %154 = memref.load %arg9[%c1_41] : memref<8xf32, #tpu.memory_space<smem>>
    %155 = vector.broadcast %154 : f32 to vector<2x32xf32>
    %156 = arith.addf %153, %155 : vector<2x32xf32>
    %cst_42 = arith.constant dense<0.000000e+00> : vector<2x128xf32>
    %157 = tpu.matmul %103, %0, %cst_42 {dimension_numbers = #tpu.dot_dimension_numbers<[1], [0], [0], [1], [0, 0, 1, 1], [], []>} : vector<2x32xf32>, vector<32x128xf32>, vector<2x128xf32> -> vector<2x128xf32>
    %158 = arith.addf %10, %157 : vector<2x128xf32>
    %159 = vector.extract_strided_slice %158 {offsets = [0, 0], sizes = [2, 96], strides = [1, 1]} : vector<2x128xf32> to vector<2x96xf32>
    %160 = arith.negf %159 : vector<2x96xf32>
    %161 = math.exp %160 : vector<2x96xf32>
    %cst_43 = arith.constant 1.000000e+00 : f32
    %162 = vector.broadcast %cst_43 : f32 to vector<2x96xf32>
    %163 = arith.addf %162, %161 : vector<2x96xf32>
    %164 = arith.divf %162, %163 : vector<2x96xf32>
    %165 = vector.extract_strided_slice %158 {offsets = [0, 96], sizes = [2, 32], strides = [1, 1]} : vector<2x128xf32> to vector<2x32xf32>
    %166 = math.tanh %165 : vector<2x32xf32>
    %167 = vector.extract_strided_slice %164 {offsets = [0, 0], sizes = [2, 32], strides = [1, 1]} : vector<2x96xf32> to vector<2x32xf32>
    %168 = vector.extract_strided_slice %164 {offsets = [0, 32], sizes = [2, 32], strides = [1, 1]} : vector<2x96xf32> to vector<2x32xf32>
    %169 = vector.extract_strided_slice %164 {offsets = [0, 64], sizes = [2, 32], strides = [1, 1]} : vector<2x96xf32> to vector<2x32xf32>
    %170 = arith.mulf %168, %101 : vector<2x32xf32>
    %171 = arith.mulf %167, %166 : vector<2x32xf32>
    %172 = arith.addf %170, %171 : vector<2x32xf32>
    %173 = math.tanh %172 : vector<2x32xf32>
    %174 = arith.mulf %169, %173 : vector<2x32xf32>
    %175 = tpu.concatenate %174, %123 in 1 : vector<2x32xf32>, vector<2x32xf32> -> vector<2x64xf32>
    %cst_44 = arith.constant dense<0.000000e+00> : vector<2x128xf32>
    %176 = tpu.matmul %175, %1, %cst_44 {dimension_numbers = #tpu.dot_dimension_numbers<[1], [0], [0], [1], [0, 0, 1, 1], [], []>} : vector<2x64xf32>, vector<64x128xf32>, vector<2x128xf32> -> vector<2x128xf32>
    %177 = vector.broadcast %2 : vector<1x128xf32> to vector<2x128xf32>
    %178 = arith.addf %176, %177 : vector<2x128xf32>
    %179 = vector.extract_strided_slice %178 {offsets = [0, 0], sizes = [2, 96], strides = [1, 1]} : vector<2x128xf32> to vector<2x96xf32>
    %180 = arith.negf %179 : vector<2x96xf32>
    %181 = math.exp %180 : vector<2x96xf32>
    %cst_45 = arith.constant 1.000000e+00 : f32
    %182 = vector.broadcast %cst_45 : f32 to vector<2x96xf32>
    %183 = arith.addf %182, %181 : vector<2x96xf32>
    %184 = arith.divf %182, %183 : vector<2x96xf32>
    %185 = vector.extract_strided_slice %178 {offsets = [0, 96], sizes = [2, 32], strides = [1, 1]} : vector<2x128xf32> to vector<2x32xf32>
    %186 = math.tanh %185 : vector<2x32xf32>
    %187 = vector.extract_strided_slice %184 {offsets = [0, 0], sizes = [2, 32], strides = [1, 1]} : vector<2x96xf32> to vector<2x32xf32>
    %188 = vector.extract_strided_slice %184 {offsets = [0, 32], sizes = [2, 32], strides = [1, 1]} : vector<2x96xf32> to vector<2x32xf32>
    %189 = vector.extract_strided_slice %184 {offsets = [0, 64], sizes = [2, 32], strides = [1, 1]} : vector<2x96xf32> to vector<2x32xf32>
    %190 = arith.mulf %188, %121 : vector<2x32xf32>
    %191 = arith.mulf %187, %186 : vector<2x32xf32>
    %192 = arith.addf %190, %191 : vector<2x32xf32>
    %193 = math.tanh %192 : vector<2x32xf32>
    %194 = arith.mulf %189, %193 : vector<2x32xf32>
    %cst_46 = arith.constant dense<0.000000e+00> : vector<2x32xf32>
    %195 = tpu.matmul %194, %3, %cst_46 {dimension_numbers = #tpu.dot_dimension_numbers<[1], [0], [0], [1], [0, 0, 1, 1], [], []>} : vector<2x32xf32>, vector<32x32xf32>, vector<2x32xf32> -> vector<2x32xf32>
    %196 = vector.broadcast %4 : vector<1x32xf32> to vector<2x32xf32>
    %197 = arith.addf %195, %196 : vector<2x32xf32>
    %198 = vector.shape_cast %197 : vector<2x32xf32> to vector<1x2x32xf32>
    %cst_47 = arith.constant dense<0.000000e+00> : vector<1xf32>
    %199 = vector.multi_reduction <add>, %198, %cst_47 [1, 2] : vector<1x2x32xf32> to vector<1xf32>
    %200 = vector.shape_cast %199 : vector<1xf32> to vector<1x1x1xf32>
    %201 = vector.extract %200[0, 0, 0] : f32 from vector<1x1x1xf32>
    %202 = vector.broadcast %201 : f32 to vector<1x1xf32>
    %cst_48 = arith.constant 6.400000e+01 : f32
    %203 = vector.broadcast %cst_48 : f32 to vector<1x1xf32>
    %204 = arith.divf %202, %203 : vector<1x1xf32>
    %205 = vector.broadcast %204 : vector<1x1xf32> to vector<2x32xf32>
    %206 = arith.subf %197, %205 : vector<2x32xf32>
    %207 = arith.mulf %206, %206 : vector<2x32xf32>
    %208 = vector.shape_cast %207 : vector<2x32xf32> to vector<1x2x32xf32>
    %cst_49 = arith.constant dense<0.000000e+00> : vector<1xf32>
    %209 = vector.multi_reduction <add>, %208, %cst_49 [1, 2] : vector<1x2x32xf32> to vector<1xf32>
    %210 = vector.shape_cast %209 : vector<1xf32> to vector<1x1x1xf32>
    %211 = vector.extract %210[0, 0, 0] : f32 from vector<1x1x1xf32>
    %212 = vector.broadcast %211 : f32 to vector<1x1xf32>
    %cst_50 = arith.constant 6.400000e+01 : f32
    %213 = vector.broadcast %cst_50 : f32 to vector<1x1xf32>
    %214 = arith.divf %212, %213 : vector<1x1xf32>
    %215 = vector.broadcast %204 : vector<1x1xf32> to vector<2x32xf32>
    %216 = arith.subf %197, %215 : vector<2x32xf32>
    %cst_51 = arith.constant 9.99999974E-6 : f32
    %217 = vector.broadcast %cst_51 : f32 to vector<1x1xf32>
    %218 = arith.addf %214, %217 : vector<1x1xf32>
    %219 = math.rsqrt %218 : vector<1x1xf32>
    %220 = vector.broadcast %219 : vector<1x1xf32> to vector<2x32xf32>
    %221 = arith.mulf %216, %220 : vector<2x32xf32>
    %c2 = arith.constant 2 : index
    %222 = memref.load %arg8[%c2] : memref<8xf32, #tpu.memory_space<smem>>
    %223 = vector.broadcast %222 : f32 to vector<2x32xf32>
    %224 = arith.mulf %221, %223 : vector<2x32xf32>
    %c2_52 = arith.constant 2 : index
    %225 = memref.load %arg9[%c2_52] : memref<8xf32, #tpu.memory_space<smem>>
    %226 = vector.broadcast %225 : f32 to vector<2x32xf32>
    %227 = arith.addf %224, %226 : vector<2x32xf32>
    %cst_53 = arith.constant dense<0.000000e+00> : vector<2x128xf32>
    %228 = tpu.matmul %174, %0, %cst_53 {dimension_numbers = #tpu.dot_dimension_numbers<[1], [0], [0], [1], [0, 0, 1, 1], [], []>} : vector<2x32xf32>, vector<32x128xf32>, vector<2x128xf32> -> vector<2x128xf32>
    %229 = arith.addf %10, %228 : vector<2x128xf32>
    %230 = vector.extract_strided_slice %229 {offsets = [0, 0], sizes = [2, 96], strides = [1, 1]} : vector<2x128xf32> to vector<2x96xf32>
    %231 = arith.negf %230 : vector<2x96xf32>
    %232 = math.exp %231 : vector<2x96xf32>
    %cst_54 = arith.constant 1.000000e+00 : f32
    %233 = vector.broadcast %cst_54 : f32 to vector<2x96xf32>
    %234 = arith.addf %233, %232 : vector<2x96xf32>
    %235 = arith.divf %233, %234 : vector<2x96xf32>
    %236 = vector.extract_strided_slice %229 {offsets = [0, 96], sizes = [2, 32], strides = [1, 1]} : vector<2x128xf32> to vector<2x32xf32>
    %237 = math.tanh %236 : vector<2x32xf32>
    %238 = vector.extract_strided_slice %235 {offsets = [0, 0], sizes = [2, 32], strides = [1, 1]} : vector<2x96xf32> to vector<2x32xf32>
    %239 = vector.extract_strided_slice %235 {offsets = [0, 32], sizes = [2, 32], strides = [1, 1]} : vector<2x96xf32> to vector<2x32xf32>
    %240 = vector.extract_strided_slice %235 {offsets = [0, 64], sizes = [2, 32], strides = [1, 1]} : vector<2x96xf32> to vector<2x32xf32>
    %241 = arith.mulf %239, %172 : vector<2x32xf32>
    %242 = arith.mulf %238, %237 : vector<2x32xf32>
    %243 = arith.addf %241, %242 : vector<2x32xf32>
    %244 = math.tanh %243 : vector<2x32xf32>
    %245 = arith.mulf %240, %244 : vector<2x32xf32>
    %246 = tpu.concatenate %245, %194 in 1 : vector<2x32xf32>, vector<2x32xf32> -> vector<2x64xf32>
    %cst_55 = arith.constant dense<0.000000e+00> : vector<2x128xf32>
    %247 = tpu.matmul %246, %1, %cst_55 {dimension_numbers = #tpu.dot_dimension_numbers<[1], [0], [0], [1], [0, 0, 1, 1], [], []>} : vector<2x64xf32>, vector<64x128xf32>, vector<2x128xf32> -> vector<2x128xf32>
    %248 = vector.broadcast %2 : vector<1x128xf32> to vector<2x128xf32>
    %249 = arith.addf %247, %248 : vector<2x128xf32>
    %250 = vector.extract_strided_slice %249 {offsets = [0, 0], sizes = [2, 96], strides = [1, 1]} : vector<2x128xf32> to vector<2x96xf32>
    %251 = arith.negf %250 : vector<2x96xf32>
    %252 = math.exp %251 : vector<2x96xf32>
    %cst_56 = arith.constant 1.000000e+00 : f32
    %253 = vector.broadcast %cst_56 : f32 to vector<2x96xf32>
    %254 = arith.addf %253, %252 : vector<2x96xf32>
    %255 = arith.divf %253, %254 : vector<2x96xf32>
    %256 = vector.extract_strided_slice %249 {offsets = [0, 96], sizes = [2, 32], strides = [1, 1]} : vector<2x128xf32> to vector<2x32xf32>
    %257 = math.tanh %256 : vector<2x32xf32>
    %258 = vector.extract_strided_slice %255 {offsets = [0, 0], sizes = [2, 32], strides = [1, 1]} : vector<2x96xf32> to vector<2x32xf32>
    %259 = vector.extract_strided_slice %255 {offsets = [0, 32], sizes = [2, 32], strides = [1, 1]} : vector<2x96xf32> to vector<2x32xf32>
    %260 = vector.extract_strided_slice %255 {offsets = [0, 64], sizes = [2, 32], strides = [1, 1]} : vector<2x96xf32> to vector<2x32xf32>
    %261 = arith.mulf %259, %192 : vector<2x32xf32>
    %262 = arith.mulf %258, %257 : vector<2x32xf32>
    %263 = arith.addf %261, %262 : vector<2x32xf32>
    %264 = math.tanh %263 : vector<2x32xf32>
    %265 = arith.mulf %260, %264 : vector<2x32xf32>
    %cst_57 = arith.constant dense<0.000000e+00> : vector<2x32xf32>
    %266 = tpu.matmul %265, %3, %cst_57 {dimension_numbers = #tpu.dot_dimension_numbers<[1], [0], [0], [1], [0, 0, 1, 1], [], []>} : vector<2x32xf32>, vector<32x32xf32>, vector<2x32xf32> -> vector<2x32xf32>
    %267 = vector.broadcast %4 : vector<1x32xf32> to vector<2x32xf32>
    %268 = arith.addf %266, %267 : vector<2x32xf32>
    %269 = vector.shape_cast %268 : vector<2x32xf32> to vector<1x2x32xf32>
    %cst_58 = arith.constant dense<0.000000e+00> : vector<1xf32>
    %270 = vector.multi_reduction <add>, %269, %cst_58 [1, 2] : vector<1x2x32xf32> to vector<1xf32>
    %271 = vector.shape_cast %270 : vector<1xf32> to vector<1x1x1xf32>
    %272 = vector.extract %271[0, 0, 0] : f32 from vector<1x1x1xf32>
    %273 = vector.broadcast %272 : f32 to vector<1x1xf32>
    %cst_59 = arith.constant 6.400000e+01 : f32
    %274 = vector.broadcast %cst_59 : f32 to vector<1x1xf32>
    %275 = arith.divf %273, %274 : vector<1x1xf32>
    %276 = vector.broadcast %275 : vector<1x1xf32> to vector<2x32xf32>
    %277 = arith.subf %268, %276 : vector<2x32xf32>
    %278 = arith.mulf %277, %277 : vector<2x32xf32>
    %279 = vector.shape_cast %278 : vector<2x32xf32> to vector<1x2x32xf32>
    %cst_60 = arith.constant dense<0.000000e+00> : vector<1xf32>
    %280 = vector.multi_reduction <add>, %279, %cst_60 [1, 2] : vector<1x2x32xf32> to vector<1xf32>
    %281 = vector.shape_cast %280 : vector<1xf32> to vector<1x1x1xf32>
    %282 = vector.extract %281[0, 0, 0] : f32 from vector<1x1x1xf32>
    %283 = vector.broadcast %282 : f32 to vector<1x1xf32>
    %cst_61 = arith.constant 6.400000e+01 : f32
    %284 = vector.broadcast %cst_61 : f32 to vector<1x1xf32>
    %285 = arith.divf %283, %284 : vector<1x1xf32>
    %286 = vector.broadcast %275 : vector<1x1xf32> to vector<2x32xf32>
    %287 = arith.subf %268, %286 : vector<2x32xf32>
    %cst_62 = arith.constant 9.99999974E-6 : f32
    %288 = vector.broadcast %cst_62 : f32 to vector<1x1xf32>
    %289 = arith.addf %285, %288 : vector<1x1xf32>
    %290 = math.rsqrt %289 : vector<1x1xf32>
    %291 = vector.broadcast %290 : vector<1x1xf32> to vector<2x32xf32>
    %292 = arith.mulf %287, %291 : vector<2x32xf32>
    %c3 = arith.constant 3 : index
    %293 = memref.load %arg8[%c3] : memref<8xf32, #tpu.memory_space<smem>>
    %294 = vector.broadcast %293 : f32 to vector<2x32xf32>
    %295 = arith.mulf %292, %294 : vector<2x32xf32>
    %c3_63 = arith.constant 3 : index
    %296 = memref.load %arg9[%c3_63] : memref<8xf32, #tpu.memory_space<smem>>
    %297 = vector.broadcast %296 : f32 to vector<2x32xf32>
    %298 = arith.addf %295, %297 : vector<2x32xf32>
    %cst_64 = arith.constant dense<0.000000e+00> : vector<2x128xf32>
    %299 = tpu.matmul %245, %0, %cst_64 {dimension_numbers = #tpu.dot_dimension_numbers<[1], [0], [0], [1], [0, 0, 1, 1], [], []>} : vector<2x32xf32>, vector<32x128xf32>, vector<2x128xf32> -> vector<2x128xf32>
    %300 = arith.addf %10, %299 : vector<2x128xf32>
    %301 = vector.extract_strided_slice %300 {offsets = [0, 0], sizes = [2, 96], strides = [1, 1]} : vector<2x128xf32> to vector<2x96xf32>
    %302 = arith.negf %301 : vector<2x96xf32>
    %303 = math.exp %302 : vector<2x96xf32>
    %cst_65 = arith.constant 1.000000e+00 : f32
    %304 = vector.broadcast %cst_65 : f32 to vector<2x96xf32>
    %305 = arith.addf %304, %303 : vector<2x96xf32>
    %306 = arith.divf %304, %305 : vector<2x96xf32>
    %307 = vector.extract_strided_slice %300 {offsets = [0, 96], sizes = [2, 32], strides = [1, 1]} : vector<2x128xf32> to vector<2x32xf32>
    %308 = math.tanh %307 : vector<2x32xf32>
    %309 = vector.extract_strided_slice %306 {offsets = [0, 0], sizes = [2, 32], strides = [1, 1]} : vector<2x96xf32> to vector<2x32xf32>
    %310 = vector.extract_strided_slice %306 {offsets = [0, 32], sizes = [2, 32], strides = [1, 1]} : vector<2x96xf32> to vector<2x32xf32>
    %311 = vector.extract_strided_slice %306 {offsets = [0, 64], sizes = [2, 32], strides = [1, 1]} : vector<2x96xf32> to vector<2x32xf32>
    %312 = arith.mulf %310, %243 : vector<2x32xf32>
    %313 = arith.mulf %309, %308 : vector<2x32xf32>
    %314 = arith.addf %312, %313 : vector<2x32xf32>
    %315 = math.tanh %314 : vector<2x32xf32>
    %316 = arith.mulf %311, %315 : vector<2x32xf32>
    %317 = tpu.concatenate %316, %265 in 1 : vector<2x32xf32>, vector<2x32xf32> -> vector<2x64xf32>
    %cst_66 = arith.constant dense<0.000000e+00> : vector<2x128xf32>
    %318 = tpu.matmul %317, %1, %cst_66 {dimension_numbers = #tpu.dot_dimension_numbers<[1], [0], [0], [1], [0, 0, 1, 1], [], []>} : vector<2x64xf32>, vector<64x128xf32>, vector<2x128xf32> -> vector<2x128xf32>
    %319 = vector.broadcast %2 : vector<1x128xf32> to vector<2x128xf32>
    %320 = arith.addf %318, %319 : vector<2x128xf32>
    %321 = vector.extract_strided_slice %320 {offsets = [0, 0], sizes = [2, 96], strides = [1, 1]} : vector<2x128xf32> to vector<2x96xf32>
    %322 = arith.negf %321 : vector<2x96xf32>
    %323 = math.exp %322 : vector<2x96xf32>
    %cst_67 = arith.constant 1.000000e+00 : f32
    %324 = vector.broadcast %cst_67 : f32 to vector<2x96xf32>
    %325 = arith.addf %324, %323 : vector<2x96xf32>
    %326 = arith.divf %324, %325 : vector<2x96xf32>
    %327 = vector.extract_strided_slice %320 {offsets = [0, 96], sizes = [2, 32], strides = [1, 1]} : vector<2x128xf32> to vector<2x32xf32>
    %328 = math.tanh %327 : vector<2x32xf32>
    %329 = vector.extract_strided_slice %326 {offsets = [0, 0], sizes = [2, 32], strides = [1, 1]} : vector<2x96xf32> to vector<2x32xf32>
    %330 = vector.extract_strided_slice %326 {offsets = [0, 32], sizes = [2, 32], strides = [1, 1]} : vector<2x96xf32> to vector<2x32xf32>
    %331 = vector.extract_strided_slice %326 {offsets = [0, 64], sizes = [2, 32], strides = [1, 1]} : vector<2x96xf32> to vector<2x32xf32>
    %332 = arith.mulf %330, %263 : vector<2x32xf32>
    %333 = arith.mulf %329, %328 : vector<2x32xf32>
    %334 = arith.addf %332, %333 : vector<2x32xf32>
    %335 = math.tanh %334 : vector<2x32xf32>
    %336 = arith.mulf %331, %335 : vector<2x32xf32>
    %cst_68 = arith.constant dense<0.000000e+00> : vector<2x32xf32>
    %337 = tpu.matmul %336, %3, %cst_68 {dimension_numbers = #tpu.dot_dimension_numbers<[1], [0], [0], [1], [0, 0, 1, 1], [], []>} : vector<2x32xf32>, vector<32x32xf32>, vector<2x32xf32> -> vector<2x32xf32>
    %338 = vector.broadcast %4 : vector<1x32xf32> to vector<2x32xf32>
    %339 = arith.addf %337, %338 : vector<2x32xf32>
    %340 = vector.shape_cast %339 : vector<2x32xf32> to vector<1x2x32xf32>
    %cst_69 = arith.constant dense<0.000000e+00> : vector<1xf32>
    %341 = vector.multi_reduction <add>, %340, %cst_69 [1, 2] : vector<1x2x32xf32> to vector<1xf32>
    %342 = vector.shape_cast %341 : vector<1xf32> to vector<1x1x1xf32>
    %343 = vector.extract %342[0, 0, 0] : f32 from vector<1x1x1xf32>
    %344 = vector.broadcast %343 : f32 to vector<1x1xf32>
    %cst_70 = arith.constant 6.400000e+01 : f32
    %345 = vector.broadcast %cst_70 : f32 to vector<1x1xf32>
    %346 = arith.divf %344, %345 : vector<1x1xf32>
    %347 = vector.broadcast %346 : vector<1x1xf32> to vector<2x32xf32>
    %348 = arith.subf %339, %347 : vector<2x32xf32>
    %349 = arith.mulf %348, %348 : vector<2x32xf32>
    %350 = vector.shape_cast %349 : vector<2x32xf32> to vector<1x2x32xf32>
    %cst_71 = arith.constant dense<0.000000e+00> : vector<1xf32>
    %351 = vector.multi_reduction <add>, %350, %cst_71 [1, 2] : vector<1x2x32xf32> to vector<1xf32>
    %352 = vector.shape_cast %351 : vector<1xf32> to vector<1x1x1xf32>
    %353 = vector.extract %352[0, 0, 0] : f32 from vector<1x1x1xf32>
    %354 = vector.broadcast %353 : f32 to vector<1x1xf32>
    %cst_72 = arith.constant 6.400000e+01 : f32
    %355 = vector.broadcast %cst_72 : f32 to vector<1x1xf32>
    %356 = arith.divf %354, %355 : vector<1x1xf32>
    %357 = vector.broadcast %346 : vector<1x1xf32> to vector<2x32xf32>
    %358 = arith.subf %339, %357 : vector<2x32xf32>
    %cst_73 = arith.constant 9.99999974E-6 : f32
    %359 = vector.broadcast %cst_73 : f32 to vector<1x1xf32>
    %360 = arith.addf %356, %359 : vector<1x1xf32>
    %361 = math.rsqrt %360 : vector<1x1xf32>
    %362 = vector.broadcast %361 : vector<1x1xf32> to vector<2x32xf32>
    %363 = arith.mulf %358, %362 : vector<2x32xf32>
    %c4 = arith.constant 4 : index
    %364 = memref.load %arg8[%c4] : memref<8xf32, #tpu.memory_space<smem>>
    %365 = vector.broadcast %364 : f32 to vector<2x32xf32>
    %366 = arith.mulf %363, %365 : vector<2x32xf32>
    %c4_74 = arith.constant 4 : index
    %367 = memref.load %arg9[%c4_74] : memref<8xf32, #tpu.memory_space<smem>>
    %368 = vector.broadcast %367 : f32 to vector<2x32xf32>
    %369 = arith.addf %366, %368 : vector<2x32xf32>
    %cst_75 = arith.constant dense<0.000000e+00> : vector<2x128xf32>
    %370 = tpu.matmul %316, %0, %cst_75 {dimension_numbers = #tpu.dot_dimension_numbers<[1], [0], [0], [1], [0, 0, 1, 1], [], []>} : vector<2x32xf32>, vector<32x128xf32>, vector<2x128xf32> -> vector<2x128xf32>
    %371 = arith.addf %10, %370 : vector<2x128xf32>
    %372 = vector.extract_strided_slice %371 {offsets = [0, 0], sizes = [2, 96], strides = [1, 1]} : vector<2x128xf32> to vector<2x96xf32>
    %373 = arith.negf %372 : vector<2x96xf32>
    %374 = math.exp %373 : vector<2x96xf32>
    %cst_76 = arith.constant 1.000000e+00 : f32
    %375 = vector.broadcast %cst_76 : f32 to vector<2x96xf32>
    %376 = arith.addf %375, %374 : vector<2x96xf32>
    %377 = arith.divf %375, %376 : vector<2x96xf32>
    %378 = vector.extract_strided_slice %371 {offsets = [0, 96], sizes = [2, 32], strides = [1, 1]} : vector<2x128xf32> to vector<2x32xf32>
    %379 = math.tanh %378 : vector<2x32xf32>
    %380 = vector.extract_strided_slice %377 {offsets = [0, 0], sizes = [2, 32], strides = [1, 1]} : vector<2x96xf32> to vector<2x32xf32>
    %381 = vector.extract_strided_slice %377 {offsets = [0, 32], sizes = [2, 32], strides = [1, 1]} : vector<2x96xf32> to vector<2x32xf32>
    %382 = vector.extract_strided_slice %377 {offsets = [0, 64], sizes = [2, 32], strides = [1, 1]} : vector<2x96xf32> to vector<2x32xf32>
    %383 = arith.mulf %381, %314 : vector<2x32xf32>
    %384 = arith.mulf %380, %379 : vector<2x32xf32>
    %385 = arith.addf %383, %384 : vector<2x32xf32>
    %386 = math.tanh %385 : vector<2x32xf32>
    %387 = arith.mulf %382, %386 : vector<2x32xf32>
    %388 = tpu.concatenate %387, %336 in 1 : vector<2x32xf32>, vector<2x32xf32> -> vector<2x64xf32>
    %cst_77 = arith.constant dense<0.000000e+00> : vector<2x128xf32>
    %389 = tpu.matmul %388, %1, %cst_77 {dimension_numbers = #tpu.dot_dimension_numbers<[1], [0], [0], [1], [0, 0, 1, 1], [], []>} : vector<2x64xf32>, vector<64x128xf32>, vector<2x128xf32> -> vector<2x128xf32>
    %390 = vector.broadcast %2 : vector<1x128xf32> to vector<2x128xf32>
    %391 = arith.addf %389, %390 : vector<2x128xf32>
    %392 = vector.extract_strided_slice %391 {offsets = [0, 0], sizes = [2, 96], strides = [1, 1]} : vector<2x128xf32> to vector<2x96xf32>
    %393 = arith.negf %392 : vector<2x96xf32>
    %394 = math.exp %393 : vector<2x96xf32>
    %cst_78 = arith.constant 1.000000e+00 : f32
    %395 = vector.broadcast %cst_78 : f32 to vector<2x96xf32>
    %396 = arith.addf %395, %394 : vector<2x96xf32>
    %397 = arith.divf %395, %396 : vector<2x96xf32>
    %398 = vector.extract_strided_slice %391 {offsets = [0, 96], sizes = [2, 32], strides = [1, 1]} : vector<2x128xf32> to vector<2x32xf32>
    %399 = math.tanh %398 : vector<2x32xf32>
    %400 = vector.extract_strided_slice %397 {offsets = [0, 0], sizes = [2, 32], strides = [1, 1]} : vector<2x96xf32> to vector<2x32xf32>
    %401 = vector.extract_strided_slice %397 {offsets = [0, 32], sizes = [2, 32], strides = [1, 1]} : vector<2x96xf32> to vector<2x32xf32>
    %402 = vector.extract_strided_slice %397 {offsets = [0, 64], sizes = [2, 32], strides = [1, 1]} : vector<2x96xf32> to vector<2x32xf32>
    %403 = arith.mulf %401, %334 : vector<2x32xf32>
    %404 = arith.mulf %400, %399 : vector<2x32xf32>
    %405 = arith.addf %403, %404 : vector<2x32xf32>
    %406 = math.tanh %405 : vector<2x32xf32>
    %407 = arith.mulf %402, %406 : vector<2x32xf32>
    %cst_79 = arith.constant dense<0.000000e+00> : vector<2x32xf32>
    %408 = tpu.matmul %407, %3, %cst_79 {dimension_numbers = #tpu.dot_dimension_numbers<[1], [0], [0], [1], [0, 0, 1, 1], [], []>} : vector<2x32xf32>, vector<32x32xf32>, vector<2x32xf32> -> vector<2x32xf32>
    %409 = vector.broadcast %4 : vector<1x32xf32> to vector<2x32xf32>
    %410 = arith.addf %408, %409 : vector<2x32xf32>
    %411 = vector.shape_cast %410 : vector<2x32xf32> to vector<1x2x32xf32>
    %cst_80 = arith.constant dense<0.000000e+00> : vector<1xf32>
    %412 = vector.multi_reduction <add>, %411, %cst_80 [1, 2] : vector<1x2x32xf32> to vector<1xf32>
    %413 = vector.shape_cast %412 : vector<1xf32> to vector<1x1x1xf32>
    %414 = vector.extract %413[0, 0, 0] : f32 from vector<1x1x1xf32>
    %415 = vector.broadcast %414 : f32 to vector<1x1xf32>
    %cst_81 = arith.constant 6.400000e+01 : f32
    %416 = vector.broadcast %cst_81 : f32 to vector<1x1xf32>
    %417 = arith.divf %415, %416 : vector<1x1xf32>
    %418 = vector.broadcast %417 : vector<1x1xf32> to vector<2x32xf32>
    %419 = arith.subf %410, %418 : vector<2x32xf32>
    %420 = arith.mulf %419, %419 : vector<2x32xf32>
    %421 = vector.shape_cast %420 : vector<2x32xf32> to vector<1x2x32xf32>
    %cst_82 = arith.constant dense<0.000000e+00> : vector<1xf32>
    %422 = vector.multi_reduction <add>, %421, %cst_82 [1, 2] : vector<1x2x32xf32> to vector<1xf32>
    %423 = vector.shape_cast %422 : vector<1xf32> to vector<1x1x1xf32>
    %424 = vector.extract %423[0, 0, 0] : f32 from vector<1x1x1xf32>
    %425 = vector.broadcast %424 : f32 to vector<1x1xf32>
    %cst_83 = arith.constant 6.400000e+01 : f32
    %426 = vector.broadcast %cst_83 : f32 to vector<1x1xf32>
    %427 = arith.divf %425, %426 : vector<1x1xf32>
    %428 = vector.broadcast %417 : vector<1x1xf32> to vector<2x32xf32>
    %429 = arith.subf %410, %428 : vector<2x32xf32>
    %cst_84 = arith.constant 9.99999974E-6 : f32
    %430 = vector.broadcast %cst_84 : f32 to vector<1x1xf32>
    %431 = arith.addf %427, %430 : vector<1x1xf32>
    %432 = math.rsqrt %431 : vector<1x1xf32>
    %433 = vector.broadcast %432 : vector<1x1xf32> to vector<2x32xf32>
    %434 = arith.mulf %429, %433 : vector<2x32xf32>
    %c5 = arith.constant 5 : index
    %435 = memref.load %arg8[%c5] : memref<8xf32, #tpu.memory_space<smem>>
    %436 = vector.broadcast %435 : f32 to vector<2x32xf32>
    %437 = arith.mulf %434, %436 : vector<2x32xf32>
    %c5_85 = arith.constant 5 : index
    %438 = memref.load %arg9[%c5_85] : memref<8xf32, #tpu.memory_space<smem>>
    %439 = vector.broadcast %438 : f32 to vector<2x32xf32>
    %440 = arith.addf %437, %439 : vector<2x32xf32>
    %cst_86 = arith.constant dense<0.000000e+00> : vector<2x128xf32>
    %441 = tpu.matmul %387, %0, %cst_86 {dimension_numbers = #tpu.dot_dimension_numbers<[1], [0], [0], [1], [0, 0, 1, 1], [], []>} : vector<2x32xf32>, vector<32x128xf32>, vector<2x128xf32> -> vector<2x128xf32>
    %442 = arith.addf %10, %441 : vector<2x128xf32>
    %443 = vector.extract_strided_slice %442 {offsets = [0, 0], sizes = [2, 96], strides = [1, 1]} : vector<2x128xf32> to vector<2x96xf32>
    %444 = arith.negf %443 : vector<2x96xf32>
    %445 = math.exp %444 : vector<2x96xf32>
    %cst_87 = arith.constant 1.000000e+00 : f32
    %446 = vector.broadcast %cst_87 : f32 to vector<2x96xf32>
    %447 = arith.addf %446, %445 : vector<2x96xf32>
    %448 = arith.divf %446, %447 : vector<2x96xf32>
    %449 = vector.extract_strided_slice %442 {offsets = [0, 96], sizes = [2, 32], strides = [1, 1]} : vector<2x128xf32> to vector<2x32xf32>
    %450 = math.tanh %449 : vector<2x32xf32>
    %451 = vector.extract_strided_slice %448 {offsets = [0, 0], sizes = [2, 32], strides = [1, 1]} : vector<2x96xf32> to vector<2x32xf32>
    %452 = vector.extract_strided_slice %448 {offsets = [0, 32], sizes = [2, 32], strides = [1, 1]} : vector<2x96xf32> to vector<2x32xf32>
    %453 = vector.extract_strided_slice %448 {offsets = [0, 64], sizes = [2, 32], strides = [1, 1]} : vector<2x96xf32> to vector<2x32xf32>
    %454 = arith.mulf %452, %385 : vector<2x32xf32>
    %455 = arith.mulf %451, %450 : vector<2x32xf32>
    %456 = arith.addf %454, %455 : vector<2x32xf32>
    %457 = math.tanh %456 : vector<2x32xf32>
    %458 = arith.mulf %453, %457 : vector<2x32xf32>
    %459 = tpu.concatenate %458, %407 in 1 : vector<2x32xf32>, vector<2x32xf32> -> vector<2x64xf32>
    %cst_88 = arith.constant dense<0.000000e+00> : vector<2x128xf32>
    %460 = tpu.matmul %459, %1, %cst_88 {dimension_numbers = #tpu.dot_dimension_numbers<[1], [0], [0], [1], [0, 0, 1, 1], [], []>} : vector<2x64xf32>, vector<64x128xf32>, vector<2x128xf32> -> vector<2x128xf32>
    %461 = vector.broadcast %2 : vector<1x128xf32> to vector<2x128xf32>
    %462 = arith.addf %460, %461 : vector<2x128xf32>
    %463 = vector.extract_strided_slice %462 {offsets = [0, 0], sizes = [2, 96], strides = [1, 1]} : vector<2x128xf32> to vector<2x96xf32>
    %464 = arith.negf %463 : vector<2x96xf32>
    %465 = math.exp %464 : vector<2x96xf32>
    %cst_89 = arith.constant 1.000000e+00 : f32
    %466 = vector.broadcast %cst_89 : f32 to vector<2x96xf32>
    %467 = arith.addf %466, %465 : vector<2x96xf32>
    %468 = arith.divf %466, %467 : vector<2x96xf32>
    %469 = vector.extract_strided_slice %462 {offsets = [0, 96], sizes = [2, 32], strides = [1, 1]} : vector<2x128xf32> to vector<2x32xf32>
    %470 = math.tanh %469 : vector<2x32xf32>
    %471 = vector.extract_strided_slice %468 {offsets = [0, 0], sizes = [2, 32], strides = [1, 1]} : vector<2x96xf32> to vector<2x32xf32>
    %472 = vector.extract_strided_slice %468 {offsets = [0, 32], sizes = [2, 32], strides = [1, 1]} : vector<2x96xf32> to vector<2x32xf32>
    %473 = vector.extract_strided_slice %468 {offsets = [0, 64], sizes = [2, 32], strides = [1, 1]} : vector<2x96xf32> to vector<2x32xf32>
    %474 = arith.mulf %472, %405 : vector<2x32xf32>
    %475 = arith.mulf %471, %470 : vector<2x32xf32>
    %476 = arith.addf %474, %475 : vector<2x32xf32>
    %477 = math.tanh %476 : vector<2x32xf32>
    %478 = arith.mulf %473, %477 : vector<2x32xf32>
    %cst_90 = arith.constant dense<0.000000e+00> : vector<2x32xf32>
    %479 = tpu.matmul %478, %3, %cst_90 {dimension_numbers = #tpu.dot_dimension_numbers<[1], [0], [0], [1], [0, 0, 1, 1], [], []>} : vector<2x32xf32>, vector<32x32xf32>, vector<2x32xf32> -> vector<2x32xf32>
    %480 = vector.broadcast %4 : vector<1x32xf32> to vector<2x32xf32>
    %481 = arith.addf %479, %480 : vector<2x32xf32>
    %482 = vector.shape_cast %481 : vector<2x32xf32> to vector<1x2x32xf32>
    %cst_91 = arith.constant dense<0.000000e+00> : vector<1xf32>
    %483 = vector.multi_reduction <add>, %482, %cst_91 [1, 2] : vector<1x2x32xf32> to vector<1xf32>
    %484 = vector.shape_cast %483 : vector<1xf32> to vector<1x1x1xf32>
    %485 = vector.extract %484[0, 0, 0] : f32 from vector<1x1x1xf32>
    %486 = vector.broadcast %485 : f32 to vector<1x1xf32>
    %cst_92 = arith.constant 6.400000e+01 : f32
    %487 = vector.broadcast %cst_92 : f32 to vector<1x1xf32>
    %488 = arith.divf %486, %487 : vector<1x1xf32>
    %489 = vector.broadcast %488 : vector<1x1xf32> to vector<2x32xf32>
    %490 = arith.subf %481, %489 : vector<2x32xf32>
    %491 = arith.mulf %490, %490 : vector<2x32xf32>
    %492 = vector.shape_cast %491 : vector<2x32xf32> to vector<1x2x32xf32>
    %cst_93 = arith.constant dense<0.000000e+00> : vector<1xf32>
    %493 = vector.multi_reduction <add>, %492, %cst_93 [1, 2] : vector<1x2x32xf32> to vector<1xf32>
    %494 = vector.shape_cast %493 : vector<1xf32> to vector<1x1x1xf32>
    %495 = vector.extract %494[0, 0, 0] : f32 from vector<1x1x1xf32>
    %496 = vector.broadcast %495 : f32 to vector<1x1xf32>
    %cst_94 = arith.constant 6.400000e+01 : f32
    %497 = vector.broadcast %cst_94 : f32 to vector<1x1xf32>
    %498 = arith.divf %496, %497 : vector<1x1xf32>
    %499 = vector.broadcast %488 : vector<1x1xf32> to vector<2x32xf32>
    %500 = arith.subf %481, %499 : vector<2x32xf32>
    %cst_95 = arith.constant 9.99999974E-6 : f32
    %501 = vector.broadcast %cst_95 : f32 to vector<1x1xf32>
    %502 = arith.addf %498, %501 : vector<1x1xf32>
    %503 = math.rsqrt %502 : vector<1x1xf32>
    %504 = vector.broadcast %503 : vector<1x1xf32> to vector<2x32xf32>
    %505 = arith.mulf %500, %504 : vector<2x32xf32>
    %c6 = arith.constant 6 : index
    %506 = memref.load %arg8[%c6] : memref<8xf32, #tpu.memory_space<smem>>
    %507 = vector.broadcast %506 : f32 to vector<2x32xf32>
    %508 = arith.mulf %505, %507 : vector<2x32xf32>
    %c6_96 = arith.constant 6 : index
    %509 = memref.load %arg9[%c6_96] : memref<8xf32, #tpu.memory_space<smem>>
    %510 = vector.broadcast %509 : f32 to vector<2x32xf32>
    %511 = arith.addf %508, %510 : vector<2x32xf32>
    %cst_97 = arith.constant dense<0.000000e+00> : vector<2x128xf32>
    %512 = tpu.matmul %458, %0, %cst_97 {dimension_numbers = #tpu.dot_dimension_numbers<[1], [0], [0], [1], [0, 0, 1, 1], [], []>} : vector<2x32xf32>, vector<32x128xf32>, vector<2x128xf32> -> vector<2x128xf32>
    %513 = arith.addf %10, %512 : vector<2x128xf32>
    %514 = vector.extract_strided_slice %513 {offsets = [0, 0], sizes = [2, 96], strides = [1, 1]} : vector<2x128xf32> to vector<2x96xf32>
    %515 = arith.negf %514 : vector<2x96xf32>
    %516 = math.exp %515 : vector<2x96xf32>
    %cst_98 = arith.constant 1.000000e+00 : f32
    %517 = vector.broadcast %cst_98 : f32 to vector<2x96xf32>
    %518 = arith.addf %517, %516 : vector<2x96xf32>
    %519 = arith.divf %517, %518 : vector<2x96xf32>
    %520 = vector.extract_strided_slice %513 {offsets = [0, 96], sizes = [2, 32], strides = [1, 1]} : vector<2x128xf32> to vector<2x32xf32>
    %521 = math.tanh %520 : vector<2x32xf32>
    %522 = vector.extract_strided_slice %519 {offsets = [0, 0], sizes = [2, 32], strides = [1, 1]} : vector<2x96xf32> to vector<2x32xf32>
    %523 = vector.extract_strided_slice %519 {offsets = [0, 32], sizes = [2, 32], strides = [1, 1]} : vector<2x96xf32> to vector<2x32xf32>
    %524 = vector.extract_strided_slice %519 {offsets = [0, 64], sizes = [2, 32], strides = [1, 1]} : vector<2x96xf32> to vector<2x32xf32>
    %525 = arith.mulf %523, %456 : vector<2x32xf32>
    %526 = arith.mulf %522, %521 : vector<2x32xf32>
    %527 = arith.addf %525, %526 : vector<2x32xf32>
    %528 = math.tanh %527 : vector<2x32xf32>
    %529 = arith.mulf %524, %528 : vector<2x32xf32>
    %530 = tpu.concatenate %529, %478 in 1 : vector<2x32xf32>, vector<2x32xf32> -> vector<2x64xf32>
    %cst_99 = arith.constant dense<0.000000e+00> : vector<2x128xf32>
    %531 = tpu.matmul %530, %1, %cst_99 {dimension_numbers = #tpu.dot_dimension_numbers<[1], [0], [0], [1], [0, 0, 1, 1], [], []>} : vector<2x64xf32>, vector<64x128xf32>, vector<2x128xf32> -> vector<2x128xf32>
    %532 = vector.broadcast %2 : vector<1x128xf32> to vector<2x128xf32>
    %533 = arith.addf %531, %532 : vector<2x128xf32>
    %534 = vector.extract_strided_slice %533 {offsets = [0, 0], sizes = [2, 96], strides = [1, 1]} : vector<2x128xf32> to vector<2x96xf32>
    %535 = arith.negf %534 : vector<2x96xf32>
    %536 = math.exp %535 : vector<2x96xf32>
    %cst_100 = arith.constant 1.000000e+00 : f32
    %537 = vector.broadcast %cst_100 : f32 to vector<2x96xf32>
    %538 = arith.addf %537, %536 : vector<2x96xf32>
    %539 = arith.divf %537, %538 : vector<2x96xf32>
    %540 = vector.extract_strided_slice %533 {offsets = [0, 96], sizes = [2, 32], strides = [1, 1]} : vector<2x128xf32> to vector<2x32xf32>
    %541 = math.tanh %540 : vector<2x32xf32>
    %542 = vector.extract_strided_slice %539 {offsets = [0, 0], sizes = [2, 32], strides = [1, 1]} : vector<2x96xf32> to vector<2x32xf32>
    %543 = vector.extract_strided_slice %539 {offsets = [0, 32], sizes = [2, 32], strides = [1, 1]} : vector<2x96xf32> to vector<2x32xf32>
    %544 = vector.extract_strided_slice %539 {offsets = [0, 64], sizes = [2, 32], strides = [1, 1]} : vector<2x96xf32> to vector<2x32xf32>
    %545 = arith.mulf %543, %476 : vector<2x32xf32>
    %546 = arith.mulf %542, %541 : vector<2x32xf32>
    %547 = arith.addf %545, %546 : vector<2x32xf32>
    %548 = math.tanh %547 : vector<2x32xf32>
    %549 = arith.mulf %544, %548 : vector<2x32xf32>
    %cst_101 = arith.constant dense<0.000000e+00> : vector<2x32xf32>
    %550 = tpu.matmul %549, %3, %cst_101 {dimension_numbers = #tpu.dot_dimension_numbers<[1], [0], [0], [1], [0, 0, 1, 1], [], []>} : vector<2x32xf32>, vector<32x32xf32>, vector<2x32xf32> -> vector<2x32xf32>
    %551 = vector.broadcast %4 : vector<1x32xf32> to vector<2x32xf32>
    %552 = arith.addf %550, %551 : vector<2x32xf32>
    %553 = vector.shape_cast %552 : vector<2x32xf32> to vector<1x2x32xf32>
    %cst_102 = arith.constant dense<0.000000e+00> : vector<1xf32>
    %554 = vector.multi_reduction <add>, %553, %cst_102 [1, 2] : vector<1x2x32xf32> to vector<1xf32>
    %555 = vector.shape_cast %554 : vector<1xf32> to vector<1x1x1xf32>
    %556 = vector.extract %555[0, 0, 0] : f32 from vector<1x1x1xf32>
    %557 = vector.broadcast %556 : f32 to vector<1x1xf32>
    %cst_103 = arith.constant 6.400000e+01 : f32
    %558 = vector.broadcast %cst_103 : f32 to vector<1x1xf32>
    %559 = arith.divf %557, %558 : vector<1x1xf32>
    %560 = vector.broadcast %559 : vector<1x1xf32> to vector<2x32xf32>
    %561 = arith.subf %552, %560 : vector<2x32xf32>
    %562 = arith.mulf %561, %561 : vector<2x32xf32>
    %563 = vector.shape_cast %562 : vector<2x32xf32> to vector<1x2x32xf32>
    %cst_104 = arith.constant dense<0.000000e+00> : vector<1xf32>
    %564 = vector.multi_reduction <add>, %563, %cst_104 [1, 2] : vector<1x2x32xf32> to vector<1xf32>
    %565 = vector.shape_cast %564 : vector<1xf32> to vector<1x1x1xf32>
    %566 = vector.extract %565[0, 0, 0] : f32 from vector<1x1x1xf32>
    %567 = vector.broadcast %566 : f32 to vector<1x1xf32>
    %cst_105 = arith.constant 6.400000e+01 : f32
    %568 = vector.broadcast %cst_105 : f32 to vector<1x1xf32>
    %569 = arith.divf %567, %568 : vector<1x1xf32>
    %570 = vector.broadcast %559 : vector<1x1xf32> to vector<2x32xf32>
    %571 = arith.subf %552, %570 : vector<2x32xf32>
    %cst_106 = arith.constant 9.99999974E-6 : f32
    %572 = vector.broadcast %cst_106 : f32 to vector<1x1xf32>
    %573 = arith.addf %569, %572 : vector<1x1xf32>
    %574 = math.rsqrt %573 : vector<1x1xf32>
    %575 = vector.broadcast %574 : vector<1x1xf32> to vector<2x32xf32>
    %576 = arith.mulf %571, %575 : vector<2x32xf32>
    %c7 = arith.constant 7 : index
    %577 = memref.load %arg8[%c7] : memref<8xf32, #tpu.memory_space<smem>>
    %578 = vector.broadcast %577 : f32 to vector<2x32xf32>
    %579 = arith.mulf %576, %578 : vector<2x32xf32>
    %c7_107 = arith.constant 7 : index
    %580 = memref.load %arg9[%c7_107] : memref<8xf32, #tpu.memory_space<smem>>
    %581 = vector.broadcast %580 : f32 to vector<2x32xf32>
    %582 = arith.addf %579, %581 : vector<2x32xf32>
    %583 = tpu.concatenate %85, %156, %227, %298, %369, %440, %511, %582 in 1 : vector<2x32xf32>, vector<2x32xf32>, vector<2x32xf32>, vector<2x32xf32>, vector<2x32xf32>, vector<2x32xf32>, vector<2x32xf32>, vector<2x32xf32> -> vector<2x256xf32>
    %c0_108 = arith.constant 0 : index
    %c0_109 = arith.constant 0 : index
    %584 = vector.load %arg10[%c0_108, %c0_109] : memref<2x256xf32, #tpu.memory_space<vmem>>, vector<2x256xf32>
    tpu.vector_store %arg10[%c0_108, %c0_109], %583 {strides = array<i32>} : memref<2x256xf32, #tpu.memory_space<vmem>>, vector<2x256xf32>,
    return
  }
}

</mosaic_0001>

<bundles_post_ra>
// kernel: tpu_custom_call.1
= control target key start
LH: loop header
LB: loop body
LE: loop exit
PB: predicated region body
PF: predicated region fallthrough
CT: control target
= control target key end

     0   :  { %15 = vsyncpa [#allocation3], 0  ;;  %s4494_s0 = inlined_call_operand.hbm [shape: f32[2,16], index: 0, kind: input, shape index: {}]   ;;  %s4495_s1 = inlined_call_operand.hbm [shape: f32[16,128], index: 1, kind: input, shape index: {}]   ;;  %s4496_s2 = inlined_call_operand.hbm [shape: f32[32,128], index: 2, kind: input, shape index: {}]   ;;  %s4497_s3 = inlined_call_operand.vmem [shape: f32[1,128], index: 3, kind: input, shape index: {}]   ;;  %s4498_s4 = inlined_call_operand.hbm [shape: f32[64,128], index: 4, kind: input, shape index: {}]   ;;  %s4499_s5 = inlined_call_operand.vmem [shape: f32[1,128], index: 5, kind: input, shape index: {}]   ;;  %s4500_s6 = inlined_call_operand.hbm [shape: f32[32,32], index: 6, kind: input, shape index: {}]   ;;  %s4501_s7 = inlined_call_operand.vmem [shape: f32[1,32], index: 7, kind: input, shape index: {}]   ;;  %s4502_s8 = inlined_call_operand.vmem [shape: f32[8], index: 8, kind: input, shape index: {}]   ;;  %s4503_s9 = inlined_call_operand.vmem [shape: f32[8], index: 9, kind: input, shape index: {}]   ;;  %s4504_s10 = inlined_call_operand.hbm [shape: f32[2,256], index: 10, kind: output, shape index: {}]  }
   0x1   :  { %16 = vsyncpa [#allocation7], 0 }
   0x2   :  { %17 = vsyncpa [#allocation10], 0 }
   0x3   :  { %18 = vsyncpa [#allocation5], 0 }
   0x4   :  { %19 = vsyncpa [#allocation14], 0 }
   0x5   :  { %20 = vsyncpa [#allocation4], 0  ;;  %s3713_s13 = smov [#allocation6]  }
   0x6   :  { %s36_s14 = sshll.u32 %s3713_s13, 4  ;;  %s37_s14 = int_to_ptr.vmem [resolvable:$true] %s36_s14 }
   0x7   :  { %s3565_s15 = scalar_lea.vmem %s37_s14, 256  ;;  %p3570_p1 = scmp.lt.s32.totalorder %s37_s14, %s37_s14 }
   0x8   :  { %p3566_p0 = scmp.ne.s32.totalorder %s37_s14, %s3565_s15  ;;  %p3571_p2 = scmp.lt.s32.totalorder %s3565_s15, %s3565_s15 }
   0xa   :  { %p3572_p3 = por %p3571_p2, %p3570_p1 }
   0xc   :  { %p3573_p4 = pnand %p3572_p3, %p3566_p0 }
   0xe   :  { %3576 = shalt.err (!%p3573_p4)
}
   0xf   :  { %s3714_s16 = smov 128   ;;  %s3715_s17 = smov 8  }
  0x10   :  { %42 = dma.hbm_to_vmem [thread:$0]  %s4495_s1, 256, %s37_s14, [#allocation7], %s3714_s16, %s3714_s16, %s3715_s17  }
  0x11   :  { %s3716_s20 = smov [#allocation9]   ;;  %s3717_s22 = smov [#allocation2]  }
  0x12   :  { %s62_s21 = sshll.u32 %s3716_s20, 4  ;;  %s27_s23 = sshll.u32 %s3717_s22, 4  ;;  %s63_s21 = int_to_ptr.vmem [resolvable:$true] %s62_s21  ;;  %s28_s23 = int_to_ptr.vmem [resolvable:$true] %s27_s23 }
  0x13   :  { %s3585_s24 = scalar_lea.vmem %s63_s21, 1024  ;;  %p3590_p6 = scmp.lt.s32.totalorder %s63_s21, %s63_s21 }
  0x14   :  { %p3586_p5 = scmp.ne.s32.totalorder %s63_s21, %s3585_s24  ;;  %p3591_p7 = scmp.lt.s32.totalorder %s3585_s24, %s3585_s24 }
  0x16   :  { %p3592_p8 = por %p3591_p7, %p3590_p6 }
  0x18   :  { %p3593_p9 = pnand %p3592_p8, %p3586_p5 }
  0x1a   :  { %3596 = shalt.err (!%p3593_p9)
}
  0x1b   :  { %68 = dma.hbm_to_vmem [thread:$0]  %s4498_s4, 1024, %s63_s21, [#allocation10], %s3714_s16, %s3714_s16, %s3715_s17  }
  0x1c   :  { %s3605_s1 = scalar_lea.vmem %s28_s23, 32  ;;  %p3610_p11 = scmp.lt.s32.totalorder %s28_s23, %s28_s23 }
  0x1d   :  { %p3606_p10 = scmp.ne.s32.totalorder %s28_s23, %s3605_s1  ;;  %p3611_p12 = scmp.lt.s32.totalorder %s3605_s1, %s3605_s1 }
  0x1f   :  { %p3612_p13 = por %p3611_p12, %p3610_p11 }
  0x21   :  { %p3613_p0 = pnand %p3612_p13, %p3606_p10 }
  0x23   :  { %3616 = shalt.err (!%p3613_p0)
}
  0x24   :  { %30 = dma.hbm_to_vmem [thread:$0]  %s4494_s0, 32, %s28_s23, [#allocation3]  }
  0x25   :  { %s3718_s29 = smov [#allocation8]   ;;  %s3719_s11 = smov [#allocation11]  }
  0x26   :  { %s48_s30 = sshll.u32 %s3718_s29, 4  ;;  %s76_s12 = sshll.u32 %s3719_s11, 4  ;;  %s49_s30 = int_to_ptr.vmem [resolvable:$true] %s48_s30  ;;  %s77_s12 = int_to_ptr.vmem [resolvable:$true] %s76_s12 }
  0x27   :  { %s3625_s13 = scalar_lea.vmem %s49_s30, 512  ;;  %p3630_p2 = scmp.lt.s32.totalorder %s49_s30, %s49_s30 }
  0x28   :  { %p3626_p1 = scmp.ne.s32.totalorder %s49_s30, %s3625_s13  ;;  %p3631_p3 = scmp.lt.s32.totalorder %s3625_s13, %s3625_s13 }
  0x2a   :  { %p3632_p4 = por %p3631_p3, %p3630_p2 }
  0x2c   :  { %p3633_p5 = pnand %p3632_p4, %p3626_p1 }
  0x2e   :  { %3636 = shalt.err (!%p3633_p5)
}
  0x2f   :  { %54 = dma.hbm_to_vmem [thread:$0]  %s4496_s2, 512, %s49_s30, [#allocation7], %s3714_s16, %s3714_s16, %s3715_s17  }
  0x30   :  { %s91_s18 = sshll.u32 %s4502_s8, 4  ;;  %s3645_s19 = scalar_lea.vmem %s77_s12, 512  ;;  %s92_s18 = int_to_ptr.vmem [resolvable:$true] %s91_s18 }
  0x31   :  { %p3646_p6 = scmp.ne.s32.totalorder %s77_s12, %s3645_s19  ;;  %p3650_p7 = scmp.lt.s32.totalorder %s77_s12, %s77_s12 }
  0x32   :  { %p3651_p8 = scmp.lt.s32.totalorder %s3645_s19, %s3645_s19 }
  0x34   :  { %p3652_p9 = por %p3651_p8, %p3650_p7 }
  0x36   :  { %p3653_p10 = pnand %p3652_p9, %p3646_p6 }
  0x38   :  { %3656 = shalt.err (!%p3653_p10)
}
  0x39   :  { %82 = dma.hbm_to_vmem [thread:$0]  %s4500_s6, 512, %s77_s12, [#allocation10], %s3714_s16, %s3714_s16, %s3715_s17  }
  0x3a   :  { %s3657_s2 = scalar_lea.vmem %s92_s18, 16  ;;  %p3662_p12 = scmp.lt.s32.totalorder %s92_s18, %s92_s18 }
  0x3b   :  { %p3658_p11 = scmp.ne.s32.totalorder %s92_s18, %s3657_s2  ;;  %p3663_p13 = scmp.lt.s32.totalorder %s3657_s2, %s3657_s2 }
  0x3d   :  { %p3664_p0 = por %p3663_p13, %p3662_p12 }
  0x3f   :  { %p3665_p1 = pnand %p3664_p0, %p3658_p11 }
  0x41   :  { %3668 = shalt.err (!%p3665_p1)
}
  0x42   :  { %s3720_s8 = smov [#allocation12]   ;;  %s101_s24 = sshll.u32 %s4503_s9, 4  ;;  %s102_s24 = int_to_ptr.vmem [resolvable:$true] %s101_s24 }
  0x43   :  { %94 = dma.vmem_to_smem %s92_s18, 16, %s3720_s8, [#allocation5]  }
  0x44   :  { %s3669_s25 = scalar_lea.vmem %s102_s24, 16  ;;  %p3674_p3 = scmp.lt.s32.totalorder %s102_s24, %s102_s24 }
  0x45   :  { %p3670_p2 = scmp.ne.s32.totalorder %s102_s24, %s3669_s25  ;;  %p3675_p4 = scmp.lt.s32.totalorder %s3669_s25, %s3669_s25 }
  0x47   :  { %p3676_p5 = por %p3675_p4, %p3674_p3 }
  0x49   :  { %p3677_p6 = pnand %p3676_p5, %p3670_p2 }
  0x4b   :  { %3680 = shalt.err (!%p3677_p6)
}
  0x4c   :  { %s3721_s6 = smov [#allocation13]  }
  0x4d   :  { %104 = dma.vmem_to_smem %s102_s24, 16, %s3721_s6, [#allocation14]  }
  0x4e   :  { %3701 = dma.done.wait [#allocation3], 32  }
  0x4f   :  { %3702 = vsyncadd [#allocation3], 4294967264 }
  0x50   :  { %3703 = dma.done.wait [#allocation7], 768  }
  0x51   :  { %3704 = vsyncadd [#allocation7], 4294966528 }
  0x52   :  { %3705 = dma.done.wait [#allocation10], 1536  }
  0x53   :  { %3706 = vsyncadd [#allocation10], 4294965760 }
  0x54   :  { %3707 = dma.done.wait [#allocation5], 16  }
  0x55   :  { %3708 = vsyncadd [#allocation5], 4294967280 }
  0x56   :  { %3709 = dma.done.wait [#allocation14], 16  }
  0x57   :  { %3710 = vsyncadd [#allocation14], 4294967280 }
  0x58   :  { %126 = sfence }
  0x59   :  { %v147_v0 = vld [vmem:[#allocation6 + $0x8] sm:$0xff]  ;;  %v3722_v2 = vmov 0.0   ;;  %v146_v3 = vld [vmem:[#allocation6] sm:$0xff]  ;;  %v145_v5 = vld [vmem:[#allocation2] sm:$0x3]  ;;  %vm155_vm0 = vcmask 130048  }
  0x5a   :  { %v3816_v1 = vld [vmem:[#allocation8 + $0x18] sm:$0xff]  ;;  %3014 = vmatprep.subr.mxu0 %v3722_v2  ;;  %3021 = vmatprep.subr.mxu1 %v3722_v2  ;;  %v3821_v4 = vld [vmem:[#allocation8 + $0x10] sm:$0xff]  ;;  %vm3723_vm1 = vmmov 0   ;;  %v3827_v6 = vld [vmem:[#allocation8 + $0x8] sm:$0xff]  ;;  %s3724_s17 = smov 32   ;;  %vm229_vm2 = vcmask 261120  }
  0x5b   :  { %3015 = vmatpush3.msra.mxu0 %v147_v0  ;;  %3022 = vmatpush3.msra.mxu1 %v3816_v1  ;;  %v3831_v7 = vld [vmem:[#allocation8] sm:$0xff]  ;;  %v2801_v8 = vld [vmem:[%s4497_s3] ss:$0 sm:$0xff]  ;;  %v3856_v25 = vld [vmem:[#allocation9 + $0x38] sm:$0xff]  ;;  %s3725_s3 = smov 64   ;;  %vm339_vm3 = vcmask 523264  }
  0x5c   :  { %3016 = vmatprep.subr.mxu0 %v3722_v2  ;;  %3023 = vmatprep.subr.mxu1 %v3722_v2  ;;  %v3858_v26 = vld [vmem:[#allocation9 + $0x30] sm:$0xff]  ;;  %v3862_v27 = vld [vmem:[#allocation9 + $0x28] sm:$0xff]  ;;  %v3866_v28 = vld [vmem:[#allocation9 + $0x20] sm:$0xff]  ;;  %s3726_s27 = smov 96   ;;  %vm518_vm4 = vcmask 254976   ;;  %s2828_s21 = sld [smem:[#allocation12 + $0x3]] }
  0x5d   :  { %3017 = vmatpush3.msra.mxu0 %v146_v3  ;;  %3018 = vmatprep.mubr.msk.f32.mxu0 %vm3723_vm1, %v3722_v2  ;;  %v3870_v29 = vld [vmem:[#allocation9 + $0x18] sm:$0xff]  ;;  %v3874_v30 = vld [vmem:[#allocation9 + $0x10] sm:$0xff]  ;;  %v3878_v32 = vld [vmem:[#allocation9 + $0x8] sm:$0xff]  ;;  %s2829_s2 = sld [smem:[#allocation13 + $0x3]]  ;;  %vm2765_vm5 = vcmask 785408  }
  0x5e   :  { %3024 = vmatpush3.msra.mxu1 %v3821_v4  ;;  %3019 = vmatmul.mubr.msk.f32.vlgmr.msra.gmra.mxu0 %vm155_vm0, %v145_v5  ;;  %v3885_v33 = vld [vmem:[#allocation9] sm:$0xff]  ;;  %v3916_v38 = vld [vmem:[%s4499_s5] ss:$0 sm:$0xff]  ;;  %v3924_v52 = vld [vmem:[#allocation11 + $0x18] sm:$0xff]  ;;  %s2814_s25 = sld [smem:[#allocation12 + $0x1]] }
  0x5f   :  { %3025 = vmatprep.subr.mxu1 %v3722_v2  ;;  %3029 = vmatprep.mubr.msk.f32.mxu1 %vm3723_vm1, %v3722_v2  ;;  %v3926_v53 = vld [vmem:[#allocation11 + $0x10] sm:$0xff]  ;;  %v3930_v54 = vld [vmem:[#allocation11 + $0x8] sm:$0xff]  ;;  %v3934_v55 = vld [vmem:[#allocation11] sm:$0xff]  ;;  %s2815_s6 = sld [smem:[#allocation13 + $0x1]] }
  0x60   :  { %3026 = vmatpush3.msra.mxu1 %v3827_v6  ;;  %3032 = vmatprep.subr.mxu0 %v3722_v2  ;;  %s2842_s9 = sld [smem:[#allocation12 + $0x5]] }
  0x61   :  { %3027 = vmatprep.subr.mxu1 %v3722_v2  ;;  %3048 = vmatprep.mubr.msk.f32.mxu0 %vm3723_vm1, %v3722_v2  ;;  %s2821_s16 = sld [smem:[#allocation12 + $0x2]] }
  0x62   :  { %3028 = vmatpush3.msra.mxu1 %v3831_v7  ;;  %3033 = vmatpush3.msra.mxu0 %v3856_v25  ;;  %s2843_s26 = sld [smem:[#allocation13 + $0x5]] }
  0x63   :  { %3030 = vmatmul.mubr.f32.vlgmr.msra.gmra.mxu1 %v3722_v2  ;;  %3051 = vmatprep.subr.mxu1 %v3722_v2  ;;  %s2822_s1 = sld [smem:[#allocation13 + $0x2]] }
  0x64   :  { %3059 = vmatprep.mubr.msk.f32.mxu1 %vm3723_vm1, %v3722_v2  ;;  %3034 = vmatprep.subr.mxu0 %v3722_v2  ;;  %s2849_s28 = sld [smem:[#allocation12 + $0x6]] }
  0x65   :  { %3035 = vmatpush3.msra.mxu0 %v3858_v26  ;;  %3052 = vmatpush3.msra.mxu1 %v3924_v52  ;;  %s2850_s29 = sld [smem:[#allocation13 + $0x6]] }
  0x66   :  { %3036 = vmatprep.subr.mxu0 %v3722_v2  ;;  %3053 = vmatprep.subr.mxu1 %v3722_v2  ;;  %s2857_s30 = sld [smem:[#allocation13 + $0x7]] }
  0x67   :  { %3037 = vmatpush3.msra.mxu0 %v3862_v27  ;;  %3054 = vmatpush3.msra.mxu1 %v3926_v53 }
  0x68   :  { %3038 = vmatprep.subr.mxu0 %v3722_v2  ;;  %3055 = vmatprep.subr.mxu1 %v3722_v2 }
  0x69   :  { %3039 = vmatpush3.msra.mxu0 %v3866_v28  ;;  %3056 = vmatpush3.msra.mxu1 %v3930_v54 }
  0x6a   :  { %3040 = vmatprep.subr.mxu0 %v3722_v2  ;;  %3057 = vmatprep.subr.mxu1 %v3722_v2 }
  0x6b   :  { %3041 = vmatpush3.msra.mxu0 %v3870_v29  ;;  %3058 = vmatpush3.msra.mxu1 %v3934_v55 }
  0x6c   :  { %3042 = vmatprep.subr.mxu0 %v3722_v2  ;;  %3062 = vmatprep.subr.mxu1 %v3722_v2 }
  0x6d   :  { %3043 = vmatpush3.msra.mxu0 %v3874_v30 }
  0x6e   :  { %3044 = vmatprep.subr.mxu0 %v3722_v2 }
  0x6f   :  { %3045 = vmatpush3.msra.mxu0 %v3878_v32 }
  0x70   :  { %3046 = vmatprep.subr.mxu0 %v3722_v2 }
  0x71   :  { %3047 = vmatpush3.msra.mxu0 %v3885_v33 }
  0x72   :  { %3073 = vmatprep.subr.mxu0 %v3722_v2 }
 0x11e   :  { %v225_v9 = vpop.f32.mrf.mxu0 }
 0x11f   :  { %v3848_v10 = vadd.f32 %v2801_v8, %v225_v9 }
 0x120   :  { %v3020_v11 = vpop.f32.mrf.mxu0 }
 0x123   :  { %v299_v12 = vpop.f32.mrf.mxu1 }
 0x124   :  { %v303_v13 = vadd.f32 %v299_v12, %v3848_v10 }
 0x125   :  { %v3031_v14 = vpop.f32.mrf.mxu1 }
 0x126   :  { %3396 = vtanh.f32 %v303_v13  ;;  %v2803_v16 = vmul.f32 -1.442695, %v303_v13 }
 0x128   :  { %3398 = vpow2.f32 %v2803_v16 }
 0x133   :  { %v3397_v15 = vpop.eup %3396 }
 0x134   :  { %313 = vrot.lane.b32.xlu0 %v3397_v15, %s3724_s17 }
 0x135   :  { %v3399_v17 = vpop.eup %3398 }
 0x136   :  { %v307_v18 = vadd.f32 1.0, %v3399_v17 }
 0x138   :  { %3400 = vrcp.f32 %v307_v18 }
 0x145   :  { %v3401_v19 = vpop.eup %3400 }
 0x146   :  { %v311_v22 = vmul.f32 0.0, %v3401_v19 }
 0x1a6   :  { %v314_v20 = vpop.permute.xlu0 %313 }
 0x1a7   :  { %v316_v21 = vmul.f32 %v3401_v19, %v314_v20 }
 0x1a9   :  { %318 = vrot.lane.b32.xlu0 %v316_v21, %s3724_s17 }
 0x21b   :  { %v319_v23 = vpop.permute.xlu0 %318 }
 0x21c   :  { %v3853_v24 = vadd.f32 %v319_v23, %v311_v22 }
 0x21e   :  { %3402 = vtanh.f32 %v3853_v24 }
 0x22b   :  { %v3403_v31 = vpop.eup %3402 }
 0x22c   :  { %324 = vrot.lane.b32.xlu1 %v3403_v31, %s3724_s17 }
 0x29e   :  { %v325_v34 = vpop.permute.xlu1 %324 }
 0x29f   :  { %v327_v35 = vmul.f32 %v3401_v19, %v325_v34 }
 0x2a1   :  { %329 = vrot.lane.b32.xlu1 %v327_v35, %s3725_s3 }
 0x313   :  { %v3890_v36 = vpop.permute.xlu1 %329 }
 0x314   :  { %v332_v37 = vsel %vm229_vm2, %v3890_v36, 0.0 }
 0x315   :  { %3049 = vmatmul.mubr.msk.f32.vlgmr.msra.gmra.mxu0 %vm339_vm3, %v332_v37 }
 0x316   :  { %3074 = vmatpush3.msra.mxu0 %v3856_v25  ;;  %3089 = vmatprep.mubr.msk.f32.mxu0 %vm3723_vm1, %v3722_v2 }
 0x317   :  { %3075 = vmatprep.subr.mxu0 %v3722_v2 }
 0x318   :  { %3076 = vmatpush3.msra.mxu0 %v3858_v26 }
 0x319   :  { %3077 = vmatprep.subr.mxu0 %v3722_v2 }
 0x31a   :  { %3078 = vmatpush3.msra.mxu0 %v3862_v27 }
 0x31b   :  { %3079 = vmatprep.subr.mxu0 %v3722_v2 }
 0x31c   :  { %3080 = vmatpush3.msra.mxu0 %v3866_v28 }
 0x31d   :  { %3081 = vmatprep.subr.mxu0 %v3722_v2 }
 0x31e   :  { %3082 = vmatpush3.msra.mxu0 %v3870_v29 }
 0x31f   :  { %3083 = vmatprep.subr.mxu0 %v3722_v2 }
 0x320   :  { %3084 = vmatpush3.msra.mxu0 %v3874_v30 }
 0x321   :  { %3085 = vmatprep.subr.mxu0 %v3722_v2 }
 0x322   :  { %3086 = vmatpush3.msra.mxu0 %v3878_v32 }
 0x323   :  { %3087 = vmatprep.subr.mxu0 %v3722_v2 }
 0x324   :  { %3088 = vmatpush3.msra.mxu0 %v3885_v33 }
 0x325   :  { %3114 = vmatprep.subr.mxu0 %v3722_v2 }
 0x3d5   :  { %v409_v39 = vpop.f32.mrf.mxu0 }
 0x3d6   :  { %v410_v40 = vadd.f32 %v3916_v38, %v409_v39 }
 0x3d7   :  { %v3050_v41 = vpop.f32.mrf.mxu0 }
 0x3d8   :  { %3404 = vtanh.f32 %v410_v40  ;;  %v2806_v43 = vmul.f32 -1.442695, %v410_v40 }
 0x3da   :  { %3406 = vpow2.f32 %v2806_v43 }
 0x3e5   :  { %v3405_v42 = vpop.eup %3404 }
 0x3e6   :  { %422 = vrot.lane.b32.xlu0 %v3405_v42, %s3724_s17 }
 0x3e7   :  { %v3407_v44 = vpop.eup %3406 }
 0x3e8   :  { %v416_v45 = vadd.f32 1.0, %v3407_v44 }
 0x3ea   :  { %3408 = vrcp.f32 %v416_v45 }
 0x3f7   :  { %v3409_v46 = vpop.eup %3408 }
 0x3f8   :  { %v420_v49 = vmul.f32 0.0, %v3409_v46 }
 0x458   :  { %v423_v47 = vpop.permute.xlu0 %422 }
 0x459   :  { %v425_v48 = vmul.f32 %v3409_v46, %v423_v47 }
 0x45b   :  { %427 = vrot.lane.b32.xlu1 %v425_v48, %s3724_s17 }
 0x4cd   :  { %v428_v50 = vpop.permute.xlu1 %427 }
 0x4ce   :  { %v3921_v51 = vadd.f32 %v428_v50, %v420_v49 }
 0x4d0   :  { %3410 = vtanh.f32 %v3921_v51 }
 0x4dd   :  { %v3411_v56 = vpop.eup %3410 }
 0x4de   :  { %433 = vrot.lane.b32.xlu0 %v3411_v56, %s3724_s17 }
 0x550   :  { %v434_v57 = vpop.permute.xlu0 %433 }
 0x551   :  { %v436_v58 = vmul.f32 %v3409_v46, %v434_v57 }
 0x553   :  { %444 = vrot.lane.b32.xlu1 %v436_v58, %s3725_s3 }
 0x5c5   :  { %v445_v59 = vpop.permute.xlu1 %444 }
 0x5c6   :  { %3060 = vmatmul.mubr.msk.f32.vlgmr.msra.gmra.mxu1 %vm229_vm2, %v445_v59 }
 0x5c7   :  { %3063 = vmatpush3.msra.mxu1 %v3816_v1  ;;  %3070 = vmatprep.mubr.msk.f32.mxu1 %vm3723_vm1, %v3722_v2 }
 0x5c8   :  { %3064 = vmatprep.subr.mxu1 %v3722_v2 }
 0x5c9   :  { %3065 = vmatpush3.msra.mxu1 %v3821_v4 }
 0x5ca   :  { %3066 = vmatprep.subr.mxu1 %v3722_v2 }
 0x5cb   :  { %3067 = vmatpush3.msra.mxu1 %v3827_v6 }
 0x5cc   :  { %3068 = vmatprep.subr.mxu1 %v3722_v2 }
 0x5cd   :  { %3069 = vmatpush3.msra.mxu1 %v3831_v7 }
 0x5ce   :  { %3071 = vmatmul.mubr.msk.f32.vlgmr.msra.gmra.mxu1 %vm229_vm2, %v3890_v36  ;;  %3092 = vmatprep.subr.mxu1 %v3722_v2 }
 0x5cf   :  { %3093 = vmatpush3.msra.mxu1 %v3924_v52  ;;  %3100 = vmatprep.mubr.msk.f32.mxu1 %vm3723_vm1, %v3722_v2 }
 0x5d0   :  { %3094 = vmatprep.subr.mxu1 %v3722_v2 }
 0x5d1   :  { %3095 = vmatpush3.msra.mxu1 %v3926_v53 }
 0x5d2   :  { %3096 = vmatprep.subr.mxu1 %v3722_v2 }
 0x5d3   :  { %3097 = vmatpush3.msra.mxu1 %v3930_v54 }
 0x5d4   :  { %3098 = vmatprep.subr.mxu1 %v3722_v2 }
 0x5d5   :  { %3099 = vmatpush3.msra.mxu1 %v3934_v55 }
 0x5d6   :  { %3103 = vmatprep.subr.mxu1 %v3722_v2 }
 0x686   :  { %v3965_v60 = vpop.f32.mrf.mxu1 }
 0x688   :  { %v3061_v61 = vpop.f32.mrf.mxu1 }
 0x68e   :  { %v623_v62 = vpop.f32.mrf.mxu1 }
 0x68f   :  { %v627_v63 = vadd.f32 %v623_v62, %v3848_v10 }
 0x690   :  { %v3072_v0 = vpop.f32.mrf.mxu1 }
 0x691   :  { %3412 = vtanh.f32 %v627_v63  ;;  %v2810_v5 = vmul.f32 -1.442695, %v627_v63 }
 0x693   :  { %3414 = vpow2.f32 %v2810_v5 }
 0x69e   :  { %v3413_v3 = vpop.eup %3412 }
 0x69f   :  { %637 = vrot.lane.b32.xlu0 %v3413_v3, %s3724_s17 }
 0x6a0   :  { %v3415_v8 = vpop.eup %3414 }
 0x6a1   :  { %v631_v9 = vadd.f32 1.0, %v3415_v8 }
 0x6a3   :  { %3416 = vrcp.f32 %v631_v9 }
 0x6b0   :  { %v3417_v11 = vpop.eup %3416 }
 0x6b1   :  { %v635_v14 = vmul.f32 %v3417_v11, %v3853_v24 }
 0x711   :  { %v638_v12 = vpop.permute.xlu0 %637 }
 0x712   :  { %v640_v13 = vmul.f32 %v3417_v11, %v638_v12 }
 0x714   :  { %642 = vrot.lane.b32.xlu1 %v640_v13, %s3724_s17 }
 0x786   :  { %v643_v15 = vpop.permute.xlu1 %642 }
 0x787   :  { %v3971_v16 = vadd.f32 %v643_v15, %v635_v14 }
 0x789   :  { %3418 = vtanh.f32 %v3971_v16 }
 0x796   :  { %v3419_v17 = vpop.eup %3418 }
 0x797   :  { %648 = vrot.lane.b32.xlu0 %v3419_v17, %s3724_s17 }
 0x79b   :  { %656 = vrot.lane.b32.xlu0 %v436_v58, %s3726_s27 }
 0x809   :  { %v649_v18 = vpop.permute.xlu0 %648 }
 0x80a   :  { %v651_v19 = vmul.f32 %v3417_v11, %v649_v18 }
 0x80c   :  { %653 = vrot.lane.b32.xlu1 %v651_v19, %s3725_s3 }
 0x80d   :  { %v657_v20 = vpop.permute.xlu0 %656 }
 0x87e   :  { %v654_v21 = vpop.permute.xlu1 %653 }
 0x87f   :  { %v659_v22 = vsel %vm229_vm2, %v654_v21, %v657_v20 }
 0x880   :  { %3090 = vmatmul.mubr.msk.f32.vlgmr.msra.gmra.mxu0 %vm339_vm3, %v659_v22 }
 0x881   :  { %3115 = vmatpush3.msra.mxu0 %v3856_v25  ;;  %3130 = vmatprep.mubr.msk.f32.mxu0 %vm3723_vm1, %v3722_v2 }
 0x882   :  { %3116 = vmatprep.subr.mxu0 %v3722_v2 }
 0x883   :  { %3117 = vmatpush3.msra.mxu0 %v3858_v26 }
 0x884   :  { %3118 = vmatprep.subr.mxu0 %v3722_v2 }
 0x885   :  { %3119 = vmatpush3.msra.mxu0 %v3862_v27 }
 0x886   :  { %3120 = vmatprep.subr.mxu0 %v3722_v2 }
 0x887   :  { %3121 = vmatpush3.msra.mxu0 %v3866_v28 }
 0x888   :  { %3122 = vmatprep.subr.mxu0 %v3722_v2 }
 0x889   :  { %3123 = vmatpush3.msra.mxu0 %v3870_v29 }
 0x88a   :  { %3124 = vmatprep.subr.mxu0 %v3722_v2 }
 0x88b   :  { %3125 = vmatpush3.msra.mxu0 %v3874_v30 }
 0x88c   :  { %3126 = vmatprep.subr.mxu0 %v3722_v2 }
 0x88d   :  { %3127 = vmatpush3.msra.mxu0 %v3878_v32 }
 0x88e   :  { %3128 = vmatprep.subr.mxu0 %v3722_v2 }
 0x88f   :  { %3129 = vmatpush3.msra.mxu0 %v3885_v33 }
 0x890   :  { %3155 = vmatprep.subr.mxu0 %v3722_v2 }
 0x940   :  { %v729_v23 = vpop.f32.mrf.mxu0 }
 0x941   :  { %v730_v24 = vadd.f32 %v3916_v38, %v729_v23 }
 0x942   :  { %v3091_v31 = vpop.f32.mrf.mxu0 }
 0x943   :  { %3420 = vtanh.f32 %v730_v24  ;;  %v2812_v35 = vmul.f32 -1.442695, %v730_v24 }
 0x945   :  { %3422 = vpow2.f32 %v2812_v35 }
 0x950   :  { %v3421_v34 = vpop.eup %3420 }
 0x951   :  { %742 = vrot.lane.b32.xlu1 %v3421_v34, %s3724_s17 }
 0x952   :  { %v3423_v36 = vpop.eup %3422 }
 0x953   :  { %v736_v37 = vadd.f32 1.0, %v3423_v36 }
 0x955   :  { %3424 = vrcp.f32 %v736_v37 }
 0x962   :  { %v3425_v39 = vpop.eup %3424 }
 0x963   :  { %v740_v42 = vmul.f32 %v3425_v39, %v3921_v51 }
 0x9c3   :  { %v743_v40 = vpop.permute.xlu1 %742 }
 0x9c4   :  { %v745_v41 = vmul.f32 %v3425_v39, %v743_v40 }
 0x9c6   :  { %747 = vrot.lane.b32.xlu0 %v745_v41, %s3724_s17 }
 0xa38   :  { %v748_v43 = vpop.permute.xlu0 %747 }
 0xa39   :  { %v4001_v44 = vadd.f32 %v748_v43, %v740_v42 }
 0xa3b   :  { %3426 = vtanh.f32 %v4001_v44 }
 0xa48   :  { %v3427_v45 = vpop.eup %3426 }
 0xa49   :  { %753 = vrot.lane.b32.xlu1 %v3427_v45, %s3724_s17 }
 0xabb   :  { %v754_v46 = vpop.permute.xlu1 %753 }
 0xabc   :  { %v756_v47 = vmul.f32 %v3425_v39, %v754_v46 }
 0xabe   :  { %758 = vrot.lane.b32.xlu0 %v756_v47, %s3725_s3 }
 0xb30   :  { %v759_v48 = vpop.permute.xlu0 %758 }
 0xb31   :  { %3101 = vmatmul.mubr.msk.f32.vlgmr.msra.gmra.mxu1 %vm229_vm2, %v759_v48 }
 0xb32   :  { %3104 = vmatpush3.msra.mxu1 %v3816_v1  ;;  %3111 = vmatprep.mubr.msk.f32.mxu1 %vm3723_vm1, %v3722_v2 }
 0xb33   :  { %3105 = vmatprep.subr.mxu1 %v3722_v2 }
 0xb34   :  { %3106 = vmatpush3.msra.mxu1 %v3821_v4 }
 0xb35   :  { %3107 = vmatprep.subr.mxu1 %v3722_v2 }
 0xb36   :  { %3108 = vmatpush3.msra.mxu1 %v3827_v6 }
 0xb37   :  { %3109 = vmatprep.subr.mxu1 %v3722_v2 }
 0xb38   :  { %3110 = vmatpush3.msra.mxu1 %v3831_v7 }
 0xb39   :  { %3112 = vmatmul.mubr.msk.f32.vlgmr.msra.gmra.mxu1 %vm229_vm2, %v654_v21  ;;  %3133 = vmatprep.subr.mxu1 %v3722_v2 }
 0xb3a   :  { %3134 = vmatpush3.msra.mxu1 %v3924_v52  ;;  %3141 = vmatprep.mubr.msk.f32.mxu1 %vm3723_vm1, %v3722_v2 }
 0xb3b   :  { %3135 = vmatprep.subr.mxu1 %v3722_v2 }
 0xb3c   :  { %3136 = vmatpush3.msra.mxu1 %v3926_v53 }
 0xb3d   :  { %3137 = vmatprep.subr.mxu1 %v3722_v2 }
 0xb3e   :  { %3138 = vmatpush3.msra.mxu1 %v3930_v54 }
 0xb3f   :  { %3139 = vmatprep.subr.mxu1 %v3722_v2 }
 0xb40   :  { %3140 = vmatpush3.msra.mxu1 %v3934_v55 }
 0xb41   :  { %3144 = vmatprep.subr.mxu1 %v3722_v2 }
 0xbf1   :  { %v4028_v49 = vpop.f32.mrf.mxu1 }
 0xbf3   :  { %v3102_v50 = vpop.f32.mrf.mxu1 }
 0xbf9   :  { %v935_v51 = vpop.f32.mrf.mxu1 }
 0xbfa   :  { %v939_v56 = vadd.f32 %v935_v51, %v3848_v10 }
 0xbfb   :  { %v3113_v57 = vpop.f32.mrf.mxu1 }
 0xbfc   :  { %3428 = vtanh.f32 %v939_v56  ;;  %v2817_v59 = vmul.f32 -1.442695, %v939_v56 }
 0xbfe   :  { %3430 = vpow2.f32 %v2817_v59 }
 0xc09   :  { %v3429_v58 = vpop.eup %3428 }
 0xc0a   :  { %949 = vrot.lane.b32.xlu1 %v3429_v58, %s3724_s17 }
 0xc0b   :  { %v3431_v61 = vpop.eup %3430 }
 0xc0c   :  { %v943_v62 = vadd.f32 1.0, %v3431_v61 }
 0xc0e   :  { %3432 = vrcp.f32 %v943_v62 }
 0xc1b   :  { %v3433_v63 = vpop.eup %3432 }
 0xc1c   :  { %v947_v5 = vmul.f32 %v3433_v63, %v3971_v16 }
 0xc7c   :  { %v950_v0 = vpop.permute.xlu1 %949 }
 0xc7d   :  { %v952_v3 = vmul.f32 %v3433_v63, %v950_v0 }
 0xc7f   :  { %954 = vrot.lane.b32.xlu0 %v952_v3, %s3724_s17 }
 0xcf1   :  { %v955_v8 = vpop.permute.xlu0 %954 }
 0xcf2   :  { %v4034_v9 = vadd.f32 %v955_v8, %v947_v5 }
 0xcf4   :  { %3434 = vtanh.f32 %v4034_v9 }
 0xd01   :  { %v3435_v11 = vpop.eup %3434 }
 0xd02   :  { %960 = vrot.lane.b32.xlu1 %v3435_v11, %s3724_s17 }
 0xd06   :  { %968 = vrot.lane.b32.xlu1 %v756_v47, %s3726_s27 }
 0xd74   :  { %v961_v12 = vpop.permute.xlu1 %960 }
 0xd75   :  { %v963_v13 = vmul.f32 %v3433_v63, %v961_v12 }
 0xd77   :  { %965 = vrot.lane.b32.xlu0 %v963_v13, %s3725_s3 }
 0xd78   :  { %v969_v14 = vpop.permute.xlu1 %968 }
 0xde9   :  { %v966_v15 = vpop.permute.xlu0 %965 }
 0xdea   :  { %v971_v17 = vsel %vm229_vm2, %v966_v15, %v969_v14 }
 0xdeb   :  { %3131 = vmatmul.mubr.msk.f32.vlgmr.msra.gmra.mxu0 %vm339_vm3, %v971_v17 }
 0xdec   :  { %3156 = vmatpush3.msra.mxu0 %v3856_v25  ;;  %3171 = vmatprep.mubr.msk.f32.mxu0 %vm3723_vm1, %v3722_v2 }
 0xded   :  { %3157 = vmatprep.subr.mxu0 %v3722_v2 }
 0xdee   :  { %3158 = vmatpush3.msra.mxu0 %v3858_v26 }
 0xdef   :  { %3159 = vmatprep.subr.mxu0 %v3722_v2 }
 0xdf0   :  { %3160 = vmatpush3.msra.mxu0 %v3862_v27 }
 0xdf1   :  { %3161 = vmatprep.subr.mxu0 %v3722_v2 }
 0xdf2   :  { %3162 = vmatpush3.msra.mxu0 %v3866_v28 }
 0xdf3   :  { %3163 = vmatprep.subr.mxu0 %v3722_v2 }
 0xdf4   :  { %3164 = vmatpush3.msra.mxu0 %v3870_v29 }
 0xdf5   :  { %3165 = vmatprep.subr.mxu0 %v3722_v2 }
 0xdf6   :  { %3166 = vmatpush3.msra.mxu0 %v3874_v30 }
 0xdf7   :  { %3167 = vmatprep.subr.mxu0 %v3722_v2 }
 0xdf8   :  { %3168 = vmatpush3.msra.mxu0 %v3878_v32 }
 0xdf9   :  { %3169 = vmatprep.subr.mxu0 %v3722_v2 }
 0xdfa   :  { %3170 = vmatpush3.msra.mxu0 %v3885_v33 }
 0xdfb   :  { %3196 = vmatprep.subr.mxu0 %v3722_v2 }
 0xeab   :  { %v1041_v16 = vpop.f32.mrf.mxu0 }
 0xeac   :  { %v1042_v18 = vadd.f32 %v3916_v38, %v1041_v16 }
 0xead   :  { %v3132_v19 = vpop.f32.mrf.mxu0 }
 0xeae   :  { %3436 = vtanh.f32 %v1042_v18  ;;  %v2819_v21 = vmul.f32 -1.442695, %v1042_v18 }
 0xeb0   :  { %3438 = vpow2.f32 %v2819_v21 }
 0xebb   :  { %v3437_v20 = vpop.eup %3436 }
 0xebc   :  { %1054 = vrot.lane.b32.xlu0 %v3437_v20, %s3724_s17 }
 0xebd   :  { %v3439_v22 = vpop.eup %3438 }
 0xebe   :  { %v1048_v23 = vadd.f32 1.0, %v3439_v22 }
 0xec0   :  { %3440 = vrcp.f32 %v1048_v23 }
 0xecd   :  { %v3441_v24 = vpop.eup %3440 }
 0xece   :  { %v1052_v35 = vmul.f32 %v3441_v24, %v4001_v44 }
 0xf2e   :  { %v1055_v31 = vpop.permute.xlu0 %1054 }
 0xf2f   :  { %v1057_v34 = vmul.f32 %v3441_v24, %v1055_v31 }
 0xf31   :  { %1059 = vrot.lane.b32.xlu1 %v1057_v34, %s3724_s17 }
 0xfa3   :  { %v1060_v36 = vpop.permute.xlu1 %1059 }
 0xfa4   :  { %v4064_v37 = vadd.f32 %v1060_v36, %v1052_v35 }
 0xfa6   :  { %3442 = vtanh.f32 %v4064_v37 }
 0xfb3   :  { %v3443_v39 = vpop.eup %3442 }
 0xfb4   :  { %1065 = vrot.lane.b32.xlu0 %v3443_v39, %s3724_s17 }
0x1026   :  { %v1066_v40 = vpop.permute.xlu0 %1065 }
0x1027   :  { %v1068_v41 = vmul.f32 %v3441_v24, %v1066_v40 }
0x1029   :  { %1070 = vrot.lane.b32.xlu1 %v1068_v41, %s3725_s3 }
0x109b   :  { %v1071_v42 = vpop.permute.xlu1 %1070 }
0x109c   :  { %3142 = vmatmul.mubr.msk.f32.vlgmr.msra.gmra.mxu1 %vm229_vm2, %v1071_v42 }
0x109d   :  { %3145 = vmatpush3.msra.mxu1 %v3816_v1  ;;  %3152 = vmatprep.mubr.msk.f32.mxu1 %vm3723_vm1, %v3722_v2 }
0x109e   :  { %3146 = vmatprep.subr.mxu1 %v3722_v2 }
0x109f   :  { %3147 = vmatpush3.msra.mxu1 %v3821_v4 }
0x10a0   :  { %3148 = vmatprep.subr.mxu1 %v3722_v2 }
0x10a1   :  { %3149 = vmatpush3.msra.mxu1 %v3827_v6 }
0x10a2   :  { %3150 = vmatprep.subr.mxu1 %v3722_v2 }
0x10a3   :  { %3151 = vmatpush3.msra.mxu1 %v3831_v7 }
0x10a4   :  { %3153 = vmatmul.mubr.msk.f32.vlgmr.msra.gmra.mxu1 %vm229_vm2, %v966_v15  ;;  %3174 = vmatprep.subr.mxu1 %v3722_v2 }
0x10a5   :  { %3175 = vmatpush3.msra.mxu1 %v3924_v52  ;;  %3182 = vmatprep.mubr.msk.f32.mxu1 %vm3723_vm1, %v3722_v2 }
0x10a6   :  { %3176 = vmatprep.subr.mxu1 %v3722_v2 }
0x10a7   :  { %3177 = vmatpush3.msra.mxu1 %v3926_v53 }
0x10a8   :  { %3178 = vmatprep.subr.mxu1 %v3722_v2 }
0x10a9   :  { %3179 = vmatpush3.msra.mxu1 %v3930_v54 }
0x10aa   :  { %3180 = vmatprep.subr.mxu1 %v3722_v2 }
0x10ab   :  { %3181 = vmatpush3.msra.mxu1 %v3934_v55 }
0x10ac   :  { %3185 = vmatprep.subr.mxu1 %v3722_v2 }
0x115c   :  { %v4091_v43 = vpop.f32.mrf.mxu1 }
0x115e   :  { %v3143_v44 = vpop.f32.mrf.mxu1 }
0x1164   :  { %v1247_v45 = vpop.f32.mrf.mxu1 }
0x1165   :  { %v1251_v46 = vadd.f32 %v1247_v45, %v3848_v10 }
0x1166   :  { %v3154_v47 = vpop.f32.mrf.mxu1 }
0x1167   :  { %3444 = vtanh.f32 %v1251_v46  ;;  %v2824_v50 = vmul.f32 -1.442695, %v1251_v46 }
0x1169   :  { %3446 = vpow2.f32 %v2824_v50 }
0x1174   :  { %v3445_v48 = vpop.eup %3444 }
0x1175   :  { %1261 = vrot.lane.b32.xlu0 %v3445_v48, %s3724_s17 }
0x1176   :  { %v3447_v51 = vpop.eup %3446 }
0x1177   :  { %v1255_v56 = vadd.f32 1.0, %v3447_v51 }
0x1179   :  { %3448 = vrcp.f32 %v1255_v56 }
0x1186   :  { %v3449_v57 = vpop.eup %3448 }
0x1187   :  { %v1259_v61 = vmul.f32 %v3449_v57, %v4034_v9 }
0x11e7   :  { %v1262_v58 = vpop.permute.xlu0 %1261 }
0x11e8   :  { %v1264_v59 = vmul.f32 %v3449_v57, %v1262_v58 }
0x11ea   :  { %1266 = vrot.lane.b32.xlu1 %v1264_v59, %s3724_s17 }
0x125c   :  { %v1267_v62 = vpop.permute.xlu1 %1266 }
0x125d   :  { %v4097_v63 = vadd.f32 %v1267_v62, %v1259_v61 }
0x125f   :  { %3450 = vtanh.f32 %v4097_v63 }
0x126c   :  { %v3451_v0 = vpop.eup %3450 }
0x126d   :  { %1272 = vrot.lane.b32.xlu0 %v3451_v0, %s3724_s17 }
0x1271   :  { %1280 = vrot.lane.b32.xlu0 %v1068_v41, %s3726_s27 }
0x12df   :  { %v1273_v3 = vpop.permute.xlu0 %1272 }
0x12e0   :  { %v1275_v5 = vmul.f32 %v3449_v57, %v1273_v3 }
0x12e2   :  { %1277 = vrot.lane.b32.xlu1 %v1275_v5, %s3725_s3 }
0x12e3   :  { %v1281_v8 = vpop.permute.xlu0 %1280 }
0x1354   :  { %v1278_v11 = vpop.permute.xlu1 %1277 }
0x1355   :  { %v1283_v12 = vsel %vm229_vm2, %v1278_v11, %v1281_v8 }
0x1356   :  { %3172 = vmatmul.mubr.msk.f32.vlgmr.msra.gmra.mxu0 %vm339_vm3, %v1283_v12 }
0x1357   :  { %3197 = vmatpush3.msra.mxu0 %v3856_v25  ;;  %3212 = vmatprep.mubr.msk.f32.mxu0 %vm3723_vm1, %v3722_v2 }
0x1358   :  { %3198 = vmatprep.subr.mxu0 %v3722_v2 }
0x1359   :  { %3199 = vmatpush3.msra.mxu0 %v3858_v26 }
0x135a   :  { %3200 = vmatprep.subr.mxu0 %v3722_v2 }
0x135b   :  { %3201 = vmatpush3.msra.mxu0 %v3862_v27 }
0x135c   :  { %3202 = vmatprep.subr.mxu0 %v3722_v2 }
0x135d   :  { %3203 = vmatpush3.msra.mxu0 %v3866_v28 }
0x135e   :  { %3204 = vmatprep.subr.mxu0 %v3722_v2 }
0x135f   :  { %3205 = vmatpush3.msra.mxu0 %v3870_v29 }
0x1360   :  { %3206 = vmatprep.subr.mxu0 %v3722_v2 }
0x1361   :  { %3207 = vmatpush3.msra.mxu0 %v3874_v30 }
0x1362   :  { %3208 = vmatprep.subr.mxu0 %v3722_v2 }
0x1363   :  { %3209 = vmatpush3.msra.mxu0 %v3878_v32 }
0x1364   :  { %3210 = vmatprep.subr.mxu0 %v3722_v2 }
0x1365   :  { %3211 = vmatpush3.msra.mxu0 %v3885_v33 }
0x1366   :  { %3237 = vmatprep.subr.mxu0 %v3722_v2 }
0x1416   :  { %v1353_v9 = vpop.f32.mrf.mxu0 }
0x1417   :  { %v1354_v13 = vadd.f32 %v3916_v38, %v1353_v9 }
0x1418   :  { %v3173_v14 = vpop.f32.mrf.mxu0 }
0x1419   :  { %3452 = vtanh.f32 %v1354_v13  ;;  %v2826_v17 = vmul.f32 -1.442695, %v1354_v13 }
0x141b   :  { %3454 = vpow2.f32 %v2826_v17 }
0x1426   :  { %v3453_v15 = vpop.eup %3452 }
0x1427   :  { %1366 = vrot.lane.b32.xlu1 %v3453_v15, %s3724_s17 }
0x1428   :  { %v3455_v16 = vpop.eup %3454 }
0x1429   :  { %v1360_v18 = vadd.f32 1.0, %v3455_v16  ;;  %v4196_v16 = vld [vmem:[#allocation8 + $0x18] sm:$0xff] }
0x142b   :  { %3456 = vrcp.f32 %v1360_v18  ;;  %v4202_v18 = vld [vmem:[#allocation8 + $0x10] sm:$0xff] }
0x1438   :  { %v3457_v19 = vpop.eup %3456 }
0x1439   :  { %v1364_v22 = vmul.f32 %v3457_v19, %v4064_v37 }
0x1499   :  { %v1367_v20 = vpop.permute.xlu1 %1366 }
0x149a   :  { %v1369_v21 = vmul.f32 %v3457_v19, %v1367_v20 }
0x149c   :  { %1371 = vrot.lane.b32.xlu0 %v1369_v21, %s3724_s17 }
0x150e   :  { %v1372_v23 = vpop.permute.xlu0 %1371 }
0x150f   :  { %v4127_v24 = vadd.f32 %v1372_v23, %v1364_v22 }
0x1511   :  { %3458 = vtanh.f32 %v4127_v24 }
0x151e   :  { %v3459_v31 = vpop.eup %3458 }
0x151f   :  { %1377 = vrot.lane.b32.xlu1 %v3459_v31, %s3724_s17 }
0x1591   :  { %v1378_v34 = vpop.permute.xlu1 %1377 }
0x1592   :  { %v1380_v35 = vmul.f32 %v3457_v19, %v1378_v34 }
0x1594   :  { %1382 = vrot.lane.b32.xlu0 %v1380_v35, %s3725_s3 }
0x1606   :  { %v1383_v36 = vpop.permute.xlu0 %1382 }
0x1607   :  { %3183 = vmatmul.mubr.msk.f32.vlgmr.msra.gmra.mxu1 %vm229_vm2, %v1383_v36 }
0x1608   :  { %3186 = vmatpush3.msra.mxu1 %v3816_v1  ;;  %3193 = vmatprep.mubr.msk.f32.mxu1 %vm3723_vm1, %v3722_v2 }
0x1609   :  { %3187 = vmatprep.subr.mxu1 %v3722_v2 }
0x160a   :  { %3188 = vmatpush3.msra.mxu1 %v3821_v4 }
0x160b   :  { %3189 = vmatprep.subr.mxu1 %v3722_v2 }
0x160c   :  { %3190 = vmatpush3.msra.mxu1 %v3827_v6 }
0x160d   :  { %3191 = vmatprep.subr.mxu1 %v3722_v2 }
0x160e   :  { %3192 = vmatpush3.msra.mxu1 %v3831_v7 }
0x160f   :  { %3194 = vmatmul.mubr.msk.f32.vlgmr.msra.gmra.mxu1 %vm229_vm2, %v1278_v11  ;;  %3215 = vmatprep.subr.mxu1 %v3722_v2 }
0x1610   :  { %3216 = vmatpush3.msra.mxu1 %v3924_v52  ;;  %3223 = vmatprep.mubr.msk.f32.mxu1 %vm3723_vm1, %v3722_v2 }
0x1611   :  { %3217 = vmatprep.subr.mxu1 %v3722_v2 }
0x1612   :  { %3218 = vmatpush3.msra.mxu1 %v3926_v53 }
0x1613   :  { %3219 = vmatprep.subr.mxu1 %v3722_v2 }
0x1614   :  { %3220 = vmatpush3.msra.mxu1 %v3930_v54 }
0x1615   :  { %3221 = vmatprep.subr.mxu1 %v3722_v2 }
0x1616   :  { %3222 = vmatpush3.msra.mxu1 %v3934_v55 }
0x1617   :  { %3226 = vmatprep.subr.mxu1 %v3722_v2 }
0x16c7   :  { %v4154_v1 = vpop.f32.mrf.mxu1 }
0x16c9   :  { %v3184_v4 = vpop.f32.mrf.mxu1 }
0x16cf   :  { %v1559_v37 = vpop.f32.mrf.mxu1 }
0x16d0   :  { %v1563_v39 = vadd.f32 %v1559_v37, %v3848_v10 }
0x16d1   :  { %v3195_v40 = vpop.f32.mrf.mxu1 }
0x16d2   :  { %3460 = vtanh.f32 %v1563_v39  ;;  %v2831_v42 = vmul.f32 -1.442695, %v1563_v39 }
0x16d4   :  { %3462 = vpow2.f32 %v2831_v42 }
0x16df   :  { %v3461_v41 = vpop.eup %3460 }
0x16e0   :  { %1573 = vrot.lane.b32.xlu1 %v3461_v41, %s3724_s17 }
0x16e1   :  { %v3463_v44 = vpop.eup %3462 }
0x16e2   :  { %v1567_v45 = vadd.f32 1.0, %v3463_v44 }
0x16e4   :  { %3464 = vrcp.f32 %v1567_v45 }
0x16f1   :  { %v3465_v46 = vpop.eup %3464 }
0x16f2   :  { %v1571_v50 = vmul.f32 %v3465_v46, %v4097_v63 }
0x1752   :  { %v1574_v47 = vpop.permute.xlu1 %1573 }
0x1753   :  { %v1576_v48 = vmul.f32 %v3465_v46, %v1574_v47  ;;  %v4235_v47 = vld [vmem:[#allocation9 + $0x38] sm:$0xff] }
0x1755   :  { %1578 = vrot.lane.b32.xlu0 %v1576_v48, %s3724_s17  ;;  %v4241_v48 = vld [vmem:[#allocation9 + $0x30] sm:$0xff] }
0x17c7   :  { %v1579_v51 = vpop.permute.xlu0 %1578 }
0x17c8   :  { %v4160_v56 = vadd.f32 %v1579_v51, %v1571_v50  ;;  %v4245_v50 = vld [vmem:[#allocation9 + $0x28] sm:$0xff]  ;;  %v4249_v51 = vld [vmem:[#allocation9 + $0x20] sm:$0xff] }
0x17ca   :  { %3466 = vtanh.f32 %v4160_v56 }
0x17d7   :  { %v3467_v57 = vpop.eup %3466 }
0x17d8   :  { %1584 = vrot.lane.b32.xlu1 %v3467_v57, %s3724_s17  ;;  %v4257_v57 = vld [vmem:[#allocation9 + $0x10] sm:$0xff] }
0x17dc   :  { %1592 = vrot.lane.b32.xlu1 %v1380_v35, %s3726_s27 }
0x184a   :  { %v1585_v58 = vpop.permute.xlu1 %1584 }
0x184b   :  { %v1587_v59 = vmul.f32 %v3465_v46, %v1585_v58 }
0x184d   :  { %1589 = vrot.lane.b32.xlu0 %v1587_v59, %s3725_s3 }
0x184e   :  { %v1593_v61 = vpop.permute.xlu1 %1592 }
0x18bf   :  { %v1590_v62 = vpop.permute.xlu0 %1589 }
0x18c0   :  { %v1595_v0 = vsel %vm229_vm2, %v1590_v62, %v1593_v61 }
0x18c1   :  { %3213 = vmatmul.mubr.msk.f32.vlgmr.msra.gmra.mxu0 %vm339_vm3, %v1595_v0 }
0x18c2   :  { %3238 = vmatpush3.msra.mxu0 %v3856_v25  ;;  %3253 = vmatprep.mubr.msk.f32.mxu0 %vm3723_vm1, %v3722_v2 }
0x18c3   :  { %3239 = vmatprep.subr.mxu0 %v3722_v2 }
0x18c4   :  { %3240 = vmatpush3.msra.mxu0 %v3858_v26 }
0x18c5   :  { %3241 = vmatprep.subr.mxu0 %v3722_v2 }
0x18c6   :  { %3242 = vmatpush3.msra.mxu0 %v3862_v27 }
0x18c7   :  { %3243 = vmatprep.subr.mxu0 %v3722_v2 }
0x18c8   :  { %3244 = vmatpush3.msra.mxu0 %v3866_v28 }
0x18c9   :  { %3245 = vmatprep.subr.mxu0 %v3722_v2 }
0x18ca   :  { %3246 = vmatpush3.msra.mxu0 %v3870_v29 }
0x18cb   :  { %3247 = vmatprep.subr.mxu0 %v3722_v2 }
0x18cc   :  { %3248 = vmatpush3.msra.mxu0 %v3874_v30 }
0x18cd   :  { %3249 = vmatprep.subr.mxu0 %v3722_v2 }
0x18ce   :  { %3250 = vmatpush3.msra.mxu0 %v3878_v32 }
0x18cf   :  { %3251 = vmatprep.subr.mxu0 %v3722_v2 }
0x18d0   :  { %3252 = vmatpush3.msra.mxu0 %v3885_v33 }
0x18d1   :  { %3278 = vmatprep.subr.mxu0 %v3722_v2 }
0x1981   :  { %v1665_v25 = vpop.f32.mrf.mxu0 }
0x1982   :  { %v1666_v26 = vadd.f32 %v3916_v38, %v1665_v25 }
0x1983   :  { %v3214_v27 = vpop.f32.mrf.mxu0 }
0x1984   :  { %3468 = vtanh.f32 %v1666_v26  ;;  %v2833_v29 = vmul.f32 -1.442695, %v1666_v26 }
0x1986   :  { %3470 = vpow2.f32 %v2833_v29 }
0x1991   :  { %v3469_v28 = vpop.eup %3468 }
0x1992   :  { %1678 = vrot.lane.b32.xlu0 %v3469_v28, %s3724_s17 }
0x1993   :  { %v3471_v30 = vpop.eup %3470 }
0x1994   :  { %v1672_v63 = vadd.f32 1.0, %v3471_v30 }
0x1996   :  { %3472 = vrcp.f32 %v1672_v63 }
0x19a3   :  { %v3473_v3 = vpop.eup %3472 }
0x19a4   :  { %v1676_v11 = vmul.f32 %v3473_v3, %v4127_v24 }
0x1a04   :  { %v1679_v5 = vpop.permute.xlu0 %1678 }
0x1a05   :  { %v1681_v8 = vmul.f32 %v3473_v3, %v1679_v5 }
0x1a07   :  { %1683 = vrot.lane.b32.xlu1 %v1681_v8, %s3724_s17  ;;  %v4281_v8 = vld [vmem:[#allocation8 + $0x8] sm:$0xff] }
0x1a79   :  { %v1684_v12 = vpop.permute.xlu1 %1683 }
0x1a7a   :  { %v4190_v9 = vadd.f32 %v1684_v12, %v1676_v11  ;;  %v4285_v11 = vld [vmem:[#allocation8] sm:$0xff] }
0x1a7c   :  { %3474 = vtanh.f32 %v4190_v9 }
0x1a89   :  { %v3475_v13 = vpop.eup %3474 }
0x1a8a   :  { %1689 = vrot.lane.b32.xlu0 %v3475_v13, %s3724_s17 }
0x1afc   :  { %v1690_v14 = vpop.permute.xlu0 %1689 }
0x1afd   :  { %v1692_v15 = vmul.f32 %v3473_v3, %v1690_v14 }
0x1aff   :  { %1694 = vrot.lane.b32.xlu1 %v1692_v15, %s3725_s3 }
0x1b71   :  { %v1695_v17 = vpop.permute.xlu1 %1694 }
0x1b72   :  { %3224 = vmatmul.mubr.msk.f32.vlgmr.msra.gmra.mxu1 %vm229_vm2, %v1695_v17 }
0x1b73   :  { %3227 = vmatpush3.msra.mxu1 %v4196_v16  ;;  %3234 = vmatprep.mubr.msk.f32.mxu1 %vm3723_vm1, %v3722_v2 }
0x1b74   :  { %3228 = vmatprep.subr.mxu1 %v3722_v2 }
0x1b75   :  { %3229 = vmatpush3.msra.mxu1 %v4202_v18 }
0x1b76   :  { %3230 = vmatprep.subr.mxu1 %v3722_v2 }
0x1b77   :  { %3231 = vmatpush3.msra.mxu1 %v3827_v6 }
0x1b78   :  { %3232 = vmatprep.subr.mxu1 %v3722_v2 }
0x1b79   :  { %3233 = vmatpush3.msra.mxu1 %v3831_v7 }
0x1b7a   :  { %3235 = vmatmul.mubr.msk.f32.vlgmr.msra.gmra.mxu1 %vm229_vm2, %v1590_v62  ;;  %3256 = vmatprep.subr.mxu1 %v3722_v2 }
0x1b7b   :  { %3257 = vmatpush3.msra.mxu1 %v3924_v52  ;;  %3264 = vmatprep.mubr.msk.f32.mxu1 %vm3723_vm1, %v3722_v2 }
0x1b7c   :  { %3258 = vmatprep.subr.mxu1 %v3722_v2 }
0x1b7d   :  { %3259 = vmatpush3.msra.mxu1 %v3926_v53 }
0x1b7e   :  { %3260 = vmatprep.subr.mxu1 %v3722_v2 }
0x1b7f   :  { %3261 = vmatpush3.msra.mxu1 %v3930_v54 }
0x1b80   :  { %3262 = vmatprep.subr.mxu1 %v3722_v2 }
0x1b81   :  { %3263 = vmatpush3.msra.mxu1 %v3934_v55 }
0x1b82   :  { %3267 = vmatprep.subr.mxu1 %v3722_v2 }
0x1c32   :  { %v4221_v6 = vpop.f32.mrf.mxu1 }
0x1c34   :  { %v3225_v7 = vpop.f32.mrf.mxu1 }
0x1c3a   :  { %v1871_v19 = vpop.f32.mrf.mxu1 }
0x1c3b   :  { %v1875_v20 = vadd.f32 %v1871_v19, %v3848_v10 }
0x1c3c   :  { %v3236_v21 = vpop.f32.mrf.mxu1 }
0x1c3d   :  { %3476 = vtanh.f32 %v1875_v20  ;;  %v2838_v23 = vmul.f32 -1.442695, %v1875_v20 }
0x1c3f   :  { %3478 = vpow2.f32 %v2838_v23 }
0x1c4a   :  { %v3477_v22 = vpop.eup %3476 }
0x1c4b   :  { %1885 = vrot.lane.b32.xlu0 %v3477_v22, %s3724_s17 }
0x1c4c   :  { %v3479_v24 = vpop.eup %3478 }
0x1c4d   :  { %v1879_v31 = vadd.f32 1.0, %v3479_v24 }
0x1c4f   :  { %3480 = vrcp.f32 %v1879_v31 }
0x1c5c   :  { %v3481_v34 = vpop.eup %3480 }
0x1c5d   :  { %v1883_v4 = vmul.f32 %v3481_v34, %v4160_v56  ;;  %v4253_v56 = vld [vmem:[#allocation9 + $0x18] sm:$0xff] }
0x1cbd   :  { %v1886_v35 = vpop.permute.xlu0 %1885 }
0x1cbe   :  { %v1888_v36 = vmul.f32 %v3481_v34, %v1886_v35 }
0x1cc0   :  { %1890 = vrot.lane.b32.xlu1 %v1888_v36, %s3724_s17 }
0x1d32   :  { %v1891_v37 = vpop.permute.xlu1 %1890 }
0x1d33   :  { %v4227_v39 = vadd.f32 %v1891_v37, %v1883_v4  ;;  %v3550_v4 = vld [vmem:[#allocation9 + $0x8] sm:$0xff]  ;;  %v3551_v37 = vld [vmem:[#allocation9] sm:$0xff] }
0x1d35   :  { %3482 = vtanh.f32 %v4227_v39 }
0x1d42   :  { %v3483_v40 = vpop.eup %3482 }
0x1d43   :  { %1896 = vrot.lane.b32.xlu0 %v3483_v40, %s3724_s17  ;;  %v4335_v40 = vld [vmem:[%s4499_s5] ss:$0 sm:$0xff] }
0x1d47   :  { %1904 = vrot.lane.b32.xlu0 %v1692_v15, %s3726_s27 }
0x1db5   :  { %v1897_v41 = vpop.permute.xlu0 %1896 }
0x1db6   :  { %v1899_v42 = vmul.f32 %v3481_v34, %v1897_v41 }
0x1db8   :  { %1901 = vrot.lane.b32.xlu1 %v1899_v42, %s3725_s3 }
0x1db9   :  { %v1905_v44 = vpop.permute.xlu0 %1904 }
0x1e2a   :  { %v1902_v45 = vpop.permute.xlu1 %1901 }
0x1e2b   :  { %v1907_v46 = vsel %vm229_vm2, %v1902_v45, %v1905_v44 }
0x1e2c   :  { %3254 = vmatmul.mubr.msk.f32.vlgmr.msra.gmra.mxu0 %vm339_vm3, %v1907_v46 }
0x1e2d   :  { %3279 = vmatpush3.msra.mxu0 %v4235_v47  ;;  %3294 = vmatprep.mubr.msk.f32.mxu0 %vm3723_vm1, %v3722_v2 }
0x1e2e   :  { %3280 = vmatprep.subr.mxu0 %v3722_v2 }
0x1e2f   :  { %3281 = vmatpush3.msra.mxu0 %v4241_v48 }
0x1e30   :  { %3282 = vmatprep.subr.mxu0 %v3722_v2 }
0x1e31   :  { %3283 = vmatpush3.msra.mxu0 %v4245_v50 }
0x1e32   :  { %3284 = vmatprep.subr.mxu0 %v3722_v2 }
0x1e33   :  { %3285 = vmatpush3.msra.mxu0 %v4249_v51 }
0x1e34   :  { %3286 = vmatprep.subr.mxu0 %v3722_v2 }
0x1e35   :  { %3287 = vmatpush3.msra.mxu0 %v4253_v56 }
0x1e36   :  { %3288 = vmatprep.subr.mxu0 %v3722_v2 }
0x1e37   :  { %3289 = vmatpush3.msra.mxu0 %v4257_v57 }
0x1e38   :  { %3290 = vmatprep.subr.mxu0 %v3722_v2 }
0x1e39   :  { %3291 = vmatpush3.msra.mxu0 %v3878_v32 }
0x1e3a   :  { %3292 = vmatprep.subr.mxu0 %v3722_v2 }
0x1e3b   :  { %3293 = vmatpush3.msra.mxu0 %v3885_v33 }
0x1e3c   :  { %3319 = vmatprep.subr.mxu0 %v3722_v2 }
0x1eec   :  { %v1977_v58 = vpop.f32.mrf.mxu0 }
0x1eed   :  { %v1978_v59 = vadd.f32 %v3916_v38, %v1977_v58 }
0x1eee   :  { %v3255_v61 = vpop.f32.mrf.mxu0 }
0x1eef   :  { %3484 = vtanh.f32 %v1978_v59  ;;  %v2840_v0 = vmul.f32 -1.442695, %v1978_v59  ;;  %v4348_v61 = vld [vmem:[%s4501_s7] ss:$0 sm:$0xff] }
0x1ef1   :  { %3486 = vpow2.f32 %v2840_v0  ;;  %v4354_v0 = vadd.f32 %v4348_v61, %v4028_v49 }
0x1efc   :  { %v3485_v62 = vpop.eup %3484 }
0x1efd   :  { %1990 = vrot.lane.b32.xlu1 %v3485_v62, %s3724_s17  ;;  %v515_v62 = vadd.f32 %v4348_v61, %v3965_v60 }
0x1efe   :  { %v3487_v25 = vpop.eup %3486 }
0x1eff   :  { %v1984_v26 = vadd.f32 1.0, %v3487_v25  ;;  %v519_v25 = vsel %vm518_vm4, %v515_v62, 0.0 }
0x1f01   :  { %3488 = vrcp.f32 %v1984_v26  ;;  %v832_v26 = vsel %vm518_vm4, %v4354_v0, 0.0 }
0x1f0e   :  { %v3489_v32 = vpop.eup %3488 }
0x1f0f   :  { %v1988_v33 = vmul.f32 %v3489_v32, %v4190_v9 }
0x1f6f   :  { %v1991_v27 = vpop.permute.xlu1 %1990 }
0x1f70   :  { %v1993_v28 = vmul.f32 %v3489_v32, %v1991_v27 }
0x1f72   :  { %1995 = vrot.lane.b32.xlu0 %v1993_v28, %s3724_s17 }
0x1fe4   :  { %v1996_v29 = vpop.permute.xlu0 %1995 }
0x1fe5   :  { %v4269_v30 = vadd.f32 %v1996_v29, %v1988_v33 }
0x1fe7   :  { %3490 = vtanh.f32 %v4269_v30 }
0x1ff4   :  { %v3491_v38 = vpop.eup %3490 }
0x1ff5   :  { %2001 = vrot.lane.b32.xlu1 %v3491_v38, %s3724_s17 }
0x2067   :  { %v2002_v63 = vpop.permute.xlu1 %2001 }
0x2068   :  { %v2004_v3 = vmul.f32 %v3489_v32, %v2002_v63 }
0x206a   :  { %2006 = vrot.lane.b32.xlu0 %v2004_v3, %s3725_s3 }
0x20dc   :  { %v2007_v5 = vpop.permute.xlu0 %2006 }
0x20dd   :  { %3265 = vmatmul.mubr.msk.f32.vlgmr.msra.gmra.mxu1 %vm229_vm2, %v2007_v5  ;;  %v3556_v5 = vld [vmem:[#allocation11] sm:$0xff] }
0x20de   :  { %3268 = vmatpush3.msra.mxu1 %v4196_v16  ;;  %3275 = vmatprep.mubr.msk.f32.mxu1 %vm3723_vm1, %v3722_v2 }
0x20df   :  { %3269 = vmatprep.subr.mxu1 %v3722_v2 }
0x20e0   :  { %3270 = vmatpush3.msra.mxu1 %v4202_v18 }
0x20e1   :  { %3271 = vmatprep.subr.mxu1 %v3722_v2 }
0x20e2   :  { %3272 = vmatpush3.msra.mxu1 %v4281_v8 }
0x20e3   :  { %3273 = vmatprep.subr.mxu1 %v3722_v2 }
0x20e4   :  { %3274 = vmatpush3.msra.mxu1 %v4285_v11 }
0x20e5   :  { %3276 = vmatmul.mubr.msk.f32.vlgmr.msra.gmra.mxu1 %vm229_vm2, %v1902_v45  ;;  %3297 = vmatprep.subr.mxu1 %v3722_v2 }
0x20e6   :  { %3298 = vmatpush3.msra.mxu1 %v3924_v52  ;;  %3305 = vmatprep.mubr.msk.f32.mxu1 %vm3723_vm1, %v3722_v2 }
0x20e7   :  { %3299 = vmatprep.subr.mxu1 %v3722_v2 }
0x20e8   :  { %3300 = vmatpush3.msra.mxu1 %v3926_v53 }
0x20e9   :  { %3301 = vmatprep.subr.mxu1 %v3722_v2 }
0x20ea   :  { %3302 = vmatpush3.msra.mxu1 %v3930_v54 }
0x20eb   :  { %3303 = vmatprep.subr.mxu1 %v3722_v2 }
0x20ec   :  { %3304 = vmatpush3.msra.mxu1 %v3934_v55 }
0x20ed   :  { %3308 = vmatprep.subr.mxu1 %v3722_v2 }
0x219d   :  { %v4300_v12 = vpop.f32.mrf.mxu1 }
0x219f   :  { %v3266_v52 = vpop.f32.mrf.mxu1 }
0x21a5   :  { %v2183_v9 = vpop.f32.mrf.mxu1 }
0x21a6   :  { %v2187_v13 = vadd.f32 %v2183_v9, %v3848_v10 }
0x21a7   :  { %v3277_v14 = vpop.f32.mrf.mxu1 }
0x21a8   :  { %3492 = vtanh.f32 %v2187_v13  ;;  %v2845_v53 = vmul.f32 -1.442695, %v2187_v13 }
0x21aa   :  { %3494 = vpow2.f32 %v2845_v53 }
0x21b5   :  { %v3493_v15 = vpop.eup %3492 }
0x21b6   :  { %2197 = vrot.lane.b32.xlu1 %v3493_v15, %s3724_s17 }
0x21b7   :  { %v3495_v54 = vpop.eup %3494 }
0x21b8   :  { %v2191_v17 = vadd.f32 1.0, %v3495_v54 }
0x21ba   :  { %3496 = vrcp.f32 %v2191_v17 }
0x21c7   :  { %v3497_v7 = vpop.eup %3496 }
0x21c8   :  { %v2195_v20 = vmul.f32 %v3497_v7, %v4227_v39 }
0x2228   :  { %v2198_v55 = vpop.permute.xlu1 %2197 }
0x2229   :  { %v2200_v19 = vmul.f32 %v3497_v7, %v2198_v55 }
0x222b   :  { %2202 = vrot.lane.b32.xlu0 %v2200_v19, %s3724_s17 }
0x229d   :  { %v2203_v21 = vpop.permute.xlu0 %2202 }
0x229e   :  { %v4306_v22 = vadd.f32 %v2203_v21, %v2195_v20 }
0x22a0   :  { %3498 = vtanh.f32 %v4306_v22 }
0x22ad   :  { %v3499_v23 = vpop.eup %3498 }
0x22ae   :  { %2208 = vrot.lane.b32.xlu1 %v3499_v23, %s3724_s17 }
0x22b2   :  { %2216 = vrot.lane.b32.xlu1 %v2004_v3, %s3726_s27  ;;  %v3555_v3 = vld [vmem:[#allocation11 + $0x8] sm:$0xff] }
0x2320   :  { %v2209_v24 = vpop.permute.xlu1 %2208 }
0x2321   :  { %v2211_v31 = vmul.f32 %v3497_v7, %v2209_v24 }
0x2323   :  { %2213 = vrot.lane.b32.xlu0 %v2211_v31, %s3725_s3 }
0x2324   :  { %v2217_v34 = vpop.permute.xlu1 %2216 }
0x2395   :  { %v4312_v35 = vpop.permute.xlu0 %2213 }
0x2396   :  { %v2219_v36 = vsel %vm229_vm2, %v4312_v35, %v2217_v34 }
0x2397   :  { %3295 = vmatmul.mubr.msk.f32.vlgmr.msra.gmra.mxu0 %vm339_vm3, %v2219_v36 }
0x2398   :  { %3320 = vmatpush3.msra.mxu0 %v4235_v47  ;;  %3335 = vmatprep.mubr.msk.f32.mxu0 %vm3723_vm1, %v3722_v2 }
0x2399   :  { %3321 = vmatprep.subr.mxu0 %v3722_v2 }
0x239a   :  { %3322 = vmatpush3.msra.mxu0 %v4241_v48 }
0x239b   :  { %3323 = vmatprep.subr.mxu0 %v3722_v2 }
0x239c   :  { %3324 = vmatpush3.msra.mxu0 %v4245_v50 }
0x239d   :  { %3325 = vmatprep.subr.mxu0 %v3722_v2 }
0x239e   :  { %3326 = vmatpush3.msra.mxu0 %v4249_v51 }
0x239f   :  { %3327 = vmatprep.subr.mxu0 %v3722_v2 }
0x23a0   :  { %3328 = vmatpush3.msra.mxu0 %v4253_v56 }
0x23a1   :  { %3329 = vmatprep.subr.mxu0 %v3722_v2 }
0x23a2   :  { %3330 = vmatpush3.msra.mxu0 %v4257_v57 }
0x23a3   :  { %3331 = vmatprep.subr.mxu0 %v3722_v2 }
0x23a4   :  { %3332 = vmatpush3.msra.mxu0 %v3550_v4 }
0x23a5   :  { %3333 = vmatprep.subr.mxu0 %v3722_v2 }
0x23a6   :  { %3334 = vmatpush3.msra.mxu0 %v3551_v37 }
0x2457   :  { %v2289_v39 = vpop.f32.mrf.mxu0 }
0x2458   :  { %v2290_v41 = vadd.f32 %v4335_v40, %v2289_v39 }
0x2459   :  { %v3296_v42 = vpop.f32.mrf.mxu0 }
0x245a   :  { %3500 = vtanh.f32 %v2290_v41  ;;  %v2847_v45 = vmul.f32 -1.442695, %v2290_v41 }
0x245c   :  { %3502 = vpow2.f32 %v2847_v45 }
0x2467   :  { %v3501_v44 = vpop.eup %3500 }
0x2468   :  { %2302 = vrot.lane.b32.xlu0 %v3501_v44, %s3724_s17 }
0x2469   :  { %v3503_v46 = vpop.eup %3502 }
0x246a   :  { %v2296_v47 = vadd.f32 1.0, %v3503_v46 }
0x246c   :  { %3504 = vrcp.f32 %v2296_v47 }
0x2479   :  { %v3505_v48 = vpop.eup %3504 }
0x247a   :  { %v2300_v56 = vmul.f32 %v3505_v48, %v4269_v30 }
0x24da   :  { %v2303_v50 = vpop.permute.xlu0 %2302 }
0x24db   :  { %v2305_v51 = vmul.f32 %v3505_v48, %v2303_v50 }
0x24dd   :  { %2307 = vrot.lane.b32.xlu1 %v2305_v51, %s3724_s17 }
0x254f   :  { %v2308_v57 = vpop.permute.xlu1 %2307 }
0x2550   :  { %v4341_v58 = vadd.f32 %v2308_v57, %v2300_v56 }
0x2552   :  { %3506 = vtanh.f32 %v4341_v58 }
0x255f   :  { %v3507_v59 = vpop.eup %3506 }
0x2560   :  { %2313 = vrot.lane.b32.xlu0 %v3507_v59, %s3724_s17 }
0x257f   :  { %520 = vadd.xlane.f32.xlu0 %v519_v25 }
0x2583   :  { %833 = vadd.xlane.f32.xlu0 %v832_v26 }
0x25d2   :  { %v2314_v32 = vpop.permute.xlu0 %2313 }
0x25d3   :  { %v4359_v27 = vmul.f32 %v3505_v48, %v2314_v32  ;;  %v1141_v32 = vadd.f32 %v4348_v61, %v4091_v43 }
0x25d5   :  { %2318 = vrot.lane.b32.xlu1 %v4359_v27, %s3725_s3 }
0x2608   :  { %v521_v28 = vpop.xlane.xlu0 %520 }
0x2609   :  { %v522_v60 = vrot.slane %v521_v28, 4 }
0x260b   :  { %v523_v33 = vadd.f32 %v522_v60, %v521_v28 }
0x260d   :  { %v524_v29 = vrot.slane %v523_v33, 2 }
0x260f   :  { %v525_v30 = vadd.f32 %v524_v29, %v523_v33 }
0x2611   :  { %v526_v49 = vrot.slane %v525_v30, 1 }
0x2613   :  { %v527_v38 = vadd.f32 %v526_v49, %v525_v30 }
0x2615   :  { %3349 = vpush %v527_v38 }
0x2646   :  { %s3350_s7 = spop %3349 }
0x2647   :  { %v2319_v63 = vpop.permute.xlu1 %2318  ;;  %v529_v55 = vstv %s3350_s7  ;;  %s2835_s7 = sld [smem:[#allocation12 + $0x4]] }
0x2648   :  { %3306 = vmatmul.mubr.msk.f32.vlgmr.msra.gmra.mxu1 %vm229_vm2, %v2319_v63  ;;  %v531_v19 = vmul.f32 0.015625, %v529_v55 }
0x2649   :  { %3309 = vmatpush3.msra.mxu1 %v4196_v16  ;;  %3316 = vmatprep.mubr.msk.f32.mxu1 %vm3723_vm1, %v3722_v2  ;;  %v3553_v16 = vld [vmem:[#allocation11 + $0x18] sm:$0xff] }
0x264a   :  { %3310 = vmatprep.subr.mxu1 %v3722_v2  ;;  %v4386_v20 = vsub.f32 %v515_v62, %v531_v19 }
0x264b   :  { %3311 = vmatpush3.msra.mxu1 %v4202_v18  ;;  %v3554_v18 = vld [vmem:[#allocation11 + $0x10] sm:$0xff] }
0x264c   :  { %3312 = vmatprep.subr.mxu1 %v3722_v2 }
0x264d   :  { %3313 = vmatpush3.msra.mxu1 %v4281_v8 }
0x264e   :  { %3314 = vmatprep.subr.mxu1 %v3722_v2 }
0x264f   :  { %3315 = vmatpush3.msra.mxu1 %v4285_v11 }
0x2650   :  { %3317 = vmatmul.mubr.msk.f32.vlgmr.msra.gmra.mxu1 %vm229_vm2, %v4312_v35  ;;  %3338 = vmatprep.subr.mxu1 %v3722_v2  ;;  %v834_v35 = vpop.xlane.xlu0 %833 }
0x2651   :  { %3339 = vmatpush3.msra.mxu1 %v3553_v16  ;;  %3346 = vmatprep.mubr.msk.f32.mxu1 %vm3723_vm1, %v3722_v2  ;;  %v835_v36 = vrot.slane %v834_v35, 4 }
0x2652   :  { %3340 = vmatprep.subr.mxu1 %v3722_v2 }
0x2653   :  { %3341 = vmatpush3.msra.mxu1 %v3554_v18  ;;  %v836_v4 = vadd.f32 %v835_v36, %v834_v35 }
0x2654   :  { %3342 = vmatprep.subr.mxu1 %v3722_v2 }
0x2655   :  { %3343 = vmatpush3.msra.mxu1 %v3555_v3  ;;  %v837_v37 = vrot.slane %v836_v4, 2 }
0x2656   :  { %3344 = vmatprep.subr.mxu1 %v3722_v2 }
0x2657   :  { %3345 = vmatpush3.msra.mxu1 %v3556_v5  ;;  %v838_v44 = vadd.f32 %v837_v37, %v836_v4 }
0x2708   :  { %v4381_v8 = vpop.f32.mrf.mxu1 }
0x270a   :  { %v3307_v11 = vpop.f32.mrf.mxu1 }
0x2710   :  { %v2495_v52 = vpop.f32.mrf.mxu1 }
0x2711   :  { %v2499_v9 = vadd.f32 %v2495_v52, %v3848_v10  ;;  %v533_v10 = vmul.f32 %v4386_v20, %v4386_v20 }
0x2712   :  { %v3318_v13 = vpop.f32.mrf.mxu1 }
0x2713   :  { %3508 = vtanh.f32 %v2499_v9  ;;  %v2852_v15 = vmul.f32 -1.442695, %v2499_v9  ;;  %v534_v21 = vsel %vm518_vm4, %v533_v10, 0.0 }
0x2715   :  { %3510 = vpow2.f32 %v2852_v15 }
0x2720   :  { %v3509_v14 = vpop.eup %3508 }
0x2721   :  { %2509 = vrot.lane.b32.xlu1 %v3509_v14, %s3724_s17 }
0x2722   :  { %v3511_v53 = vpop.eup %3510 }
0x2723   :  { %v2503_v54 = vadd.f32 1.0, %v3511_v53 }
0x2725   :  { %3512 = vrcp.f32 %v2503_v54  ;;  %v1453_v54 = vadd.f32 %v4348_v61, %v4154_v1 }
0x2732   :  { %v3513_v17 = vpop.eup %3512 }
0x2733   :  { %v2507_v23 = vmul.f32 %v3513_v17, %v4306_v22  ;;  %v839_v22 = vrot.slane %v838_v44, 1 }
0x2735   :  { %v840_v50 = vadd.f32 %v839_v22, %v838_v44 }
0x2793   :  { %v2510_v2 = vpop.permute.xlu1 %2509 }
0x2794   :  { %v2512_v7 = vmul.f32 %v3513_v17, %v2510_v2  ;;  %v1456_v2 = vsel %vm518_vm4, %v1453_v54, 0.0 }
0x2796   :  { %2514 = vrot.lane.b32.xlu1 %v2512_v7, %s3724_s17 }
0x27ba   :  { %535 = vadd.xlane.f32.xlu1 %v534_v21 }
0x2808   :  { %v2515_v24 = vpop.permute.xlu1 %2514 }
0x2809   :  { %v2517_v31 = vadd.f32 %v2515_v24, %v2507_v23 }
0x280b   :  { %3514 = vtanh.f32 %v2517_v31 }
0x2818   :  { %v3515_v34 = vpop.eup %3514 }
0x2819   :  { %2520 = vrot.lane.b32.xlu0 %v3515_v34, %s3724_s17 }
0x281d   :  { %2528 = vrot.lane.b32.xlu0 %v4359_v27, %s3726_s27  ;;  %v1144_v27 = vsel %vm518_vm4, %v1141_v32, 0.0 }
0x2843   :  { %v536_v39 = vpop.xlane.xlu1 %535 }
0x2844   :  { %v537_v41 = vrot.slane %v536_v39, 4 }
0x2846   :  { %v538_v42 = vadd.f32 %v537_v41, %v536_v39 }
0x2848   :  { %v539_v45 = vrot.slane %v538_v42, 2 }
0x284a   :  { %v540_v46 = vadd.f32 %v539_v45, %v538_v42 }
0x284c   :  { %v541_v47 = vrot.slane %v540_v46, 1 }
0x284e   :  { %v542_v48 = vadd.f32 %v541_v47, %v540_v46 }
0x2850   :  { %3351 = vpush %v542_v48  ;;  %v1765_v48 = vadd.f32 %v4348_v61, %v4221_v6 }
0x2851   :  { %3353 = vpush %v840_v50 }
0x2881   :  { %s4395_s11 = spop %3351 }
0x2882   :  { %s3354_s12 = spop %3353 }
0x2883   :  { %v842_v51 = vstv %s3354_s12  ;;  %s552_s12 = sld [smem:[#allocation13]] }
0x2884   :  { %v843_v56 = vmul.f32 0.015625, %v842_v51 }
0x2886   :  { %v4398_v57 = vsub.f32 %v4354_v0, %v843_v56  ;;  %v1768_v56 = vsel %vm518_vm4, %v1765_v48, 0.0 }
0x2888   :  { %v845_v59 = vmul.f32 %v4398_v57, %v4398_v57 }
0x288a   :  { %v846_v62 = vsel %vm518_vm4, %v845_v59, 0.0 }
0x288b   :  { %847 = vadd.xlane.f32.xlu0 %v846_v62  ;;  %v2521_v25 = vpop.permute.xlu0 %2520 }
0x288c   :  { %v2523_v26 = vmul.f32 %v3513_v17, %v2521_v25 }
0x288e   :  { %2525 = vrot.lane.b32.xlu1 %v2523_v26, %s3725_s3 }
0x288f   :  { %v2529_v28 = vpop.permute.xlu0 %2528 }
0x28b2   :  { %1145 = vadd.xlane.f32.xlu1 %v1144_v27 }
0x2900   :  { %v2526_v60 = vpop.permute.xlu1 %2525 }
0x2901   :  { %v2531_v0 = vsel %vm229_vm2, %v2526_v60, %v2529_v28 }
0x2902   :  { %3336 = vmatmul.mubr.msk.f32.vlgmr.msra.gmra.mxu0 %vm339_vm3, %v2531_v0 }
0x2914   :  { %v848_v33 = vpop.xlane.xlu0 %847 }
0x2915   :  { %v849_v29 = vrot.slane %v848_v33, 4 }
0x2917   :  { %v850_v30 = vadd.f32 %v849_v29, %v848_v33 }
0x2919   :  { %v851_v49 = vrot.slane %v850_v30, 2 }
0x291b   :  { %v852_v38 = vadd.f32 %v851_v49, %v850_v30 }
0x291d   :  { %v853_v63 = vrot.slane %v852_v38, 1 }
0x291f   :  { %v854_v16 = vadd.f32 %v853_v63, %v852_v38 }
0x2921   :  { %3355 = vpush %v854_v16 }
0x293b   :  { %v1146_v18 = vpop.xlane.xlu1 %1145 }
0x293c   :  { %v1147_v3 = vrot.slane %v1146_v18, 4 }
0x293e   :  { %v1148_v43 = vadd.f32 %v1147_v3, %v1146_v18 }
0x2940   :  { %v1149_v5 = vrot.slane %v1148_v43, 2 }
0x2942   :  { %v1150_v11 = vadd.f32 %v1149_v5, %v1148_v43 }
0x2944   :  { %v1151_v52 = vrot.slane %v1150_v11, 1 }
0x2946   :  { %v1152_v9 = vadd.f32 %v1151_v52, %v1150_v11 }
0x2948   :  { %3357 = vpush %v1152_v9 }
0x2952   :  { %s4409_s13 = spop %3355 }
0x2979   :  { %s3358_s4 = spop %3357 }
0x297a   :  { %v1154_v13 = vstv %s3358_s4 }
0x297b   :  { %v1155_v14 = vmul.f32 0.015625, %v1154_v13 }
0x297d   :  { %v4411_v15 = vsub.f32 %v1141_v32, %v1155_v14  ;;  %v2077_v32 = vadd.f32 %v4348_v61, %v4300_v12 }
0x297f   :  { %v1157_v53 = vmul.f32 %v4411_v15, %v4411_v15  ;;  %v2080_v27 = vsel %vm518_vm4, %v2077_v32, 0.0 }
0x2981   :  { %v1158_v17 = vsel %vm518_vm4, %v1157_v53, 0.0 }
0x2982   :  { %1159 = vadd.xlane.f32.xlu0 %v1158_v17 }
0x2986   :  { %1457 = vadd.xlane.f32.xlu0 %v1456_v2 }
0x29c2   :  { %v2601_v7 = vpop.f32.mrf.mxu0 }
0x29c3   :  { %v2602_v55 = vadd.f32 %v4335_v40, %v2601_v7 }
0x29c4   :  { %v3337_v19 = vpop.f32.mrf.mxu0 }
0x29c5   :  { %3516 = vtanh.f32 %v2602_v55  ;;  %v2854_v44 = vmul.f32 -1.442695, %v2602_v55 }
0x29c7   :  { %3518 = vpow2.f32 %v2854_v44  ;;  %v2389_v44 = vadd.f32 %v4348_v61, %v4381_v8 }
0x29d2   :  { %v3517_v10 = vpop.eup %3516 }
0x29d3   :  { %2614 = vrot.lane.b32.xlu1 %v3517_v10, %s3724_s17 }
0x29d4   :  { %v3519_v51 = vpop.eup %3518 }
0x29d5   :  { %v2608_v59 = vadd.f32 1.0, %v3519_v51 }
0x29d7   :  { %3520 = vrcp.f32 %v2608_v59 }
0x29e4   :  { %v3521_v25 = vpop.eup %3520 }
0x29e5   :  { %v2612_v49 = vmul.f32 %v3521_v25, %v4341_v58 }
0x2a0b   :  { %v1160_v21 = vpop.xlane.xlu0 %1159 }
0x2a0c   :  { %v1161_v23 = vrot.slane %v1160_v21, 4 }
0x2a0e   :  { %v1162_v24 = vadd.f32 %v1161_v23, %v1160_v21 }
0x2a0f   :  { %v1458_v31 = vpop.xlane.xlu0 %1457 }
0x2a10   :  { %v1163_v34 = vrot.slane %v1162_v24, 2  ;;  %v1459_v1 = vrot.slane %v1458_v31, 4 }
0x2a12   :  { %v1460_v35 = vadd.f32 %v1459_v1, %v1458_v31  ;;  %v1164_v36 = vadd.f32 %v1163_v34, %v1162_v24 }
0x2a14   :  { %v1461_v4 = vrot.slane %v1460_v35, 2  ;;  %v1165_v37 = vrot.slane %v1164_v36, 1 }
0x2a16   :  { %v1166_v39 = vadd.f32 %v1165_v37, %v1164_v36  ;;  %v1462_v41 = vadd.f32 %v1461_v4, %v1460_v35 }
0x2a18   :  { %3359 = vpush %v1166_v39  ;;  %v1463_v42 = vrot.slane %v1462_v41, 1 }
0x2a1a   :  { %v1464_v40 = vadd.f32 %v1463_v42, %v1462_v41 }
0x2a1c   :  { %3361 = vpush %v1464_v40 }
0x2a45   :  { %v2615_v62 = vpop.permute.xlu1 %2614 }
0x2a46   :  { %v2617_v26 = vmul.f32 %v3521_v25, %v2615_v62 }
0x2a49   :  { %s4421_s14 = spop %3359 }
0x2a4d   :  { %s3362_s0 = spop %3361 }
0x2a4e   :  { %v1466_v45 = vstv %s3362_s0 }
0x2a4f   :  { %v1467_v46 = vmul.f32 0.015625, %v1466_v45 }
0x2a51   :  { %v4423_v22 = vsub.f32 %v1453_v54, %v1467_v46  ;;  %v2392_v46 = vsel %vm518_vm4, %v2389_v44, 0.0 }
0x2a53   :  { %v1469_v47 = vmul.f32 %v4423_v22, %v4423_v22 }
0x2a55   :  { %v1470_v50 = vsel %vm518_vm4, %v1469_v47, 0.0 }
0x2a56   :  { %1471 = vadd.xlane.f32.xlu0 %v1470_v50 }
0x2a5a   :  { %1769 = vadd.xlane.f32.xlu0 %v1768_v56 }
0x2a70   :  { %2619 = vrot.lane.b32.xlu0 %v2617_v26, %s3724_s17 }
0x2a8f   :  { %2081 = vadd.xlane.f32.xlu0 %v2080_v27 }
0x2adf   :  { %v1472_v6 = vpop.xlane.xlu0 %1471 }
0x2ae0   :  { %v1473_v28 = vrot.slane %v1472_v6, 4 }
0x2ae2   :  { %v1474_v60 = vadd.f32 %v1473_v28, %v1472_v6 }
0x2ae3   :  { %v1770_v0 = vpop.xlane.xlu0 %1769 }
0x2ae4   :  { %v1475_v33 = vrot.slane %v1474_v60, 2  ;;  %v1771_v29 = vrot.slane %v1770_v0, 4 }
0x2ae6   :  { %v1772_v30 = vadd.f32 %v1771_v29, %v1770_v0  ;;  %v1476_v38 = vadd.f32 %v1475_v33, %v1474_v60 }
0x2ae7   :  { %v2620_v63 = vpop.permute.xlu0 %2619 }
0x2ae8   :  { %v1773_v16 = vrot.slane %v1772_v30, 2  ;;  %v2622_v18 = vadd.f32 %v2620_v63, %v2612_v49  ;;  %v1477_v3 = vrot.slane %v1476_v38, 1 }
0x2aea   :  { %3522 = vtanh.f32 %v2622_v18  ;;  %v1478_v43 = vadd.f32 %v1477_v3, %v1476_v38  ;;  %v1774_v12 = vadd.f32 %v1773_v16, %v1772_v30  ;;  %v1486_v18 = vstv %s2828_s21 }
0x2aec   :  { %3363 = vpush %v1478_v43  ;;  %v1775_v5 = vrot.slane %v1774_v12, 1  ;;  %v1489_v43 = vstv %s2829_s2 }
0x2aee   :  { %v1776_v11 = vadd.f32 %v1775_v5, %v1774_v12 }
0x2af0   :  { %3365 = vpush %v1776_v11 }
0x2af7   :  { %v3523_v52 = vpop.eup %3522 }
0x2af8   :  { %2625 = vrot.lane.b32.xlu1 %v3523_v52, %s3724_s17 }
0x2b18   :  { %v2082_v2 = vpop.xlane.xlu0 %2081 }
0x2b19   :  { %v2083_v7 = vrot.slane %v2082_v2, 4 }
0x2b1b   :  { %v2084_v55 = vadd.f32 %v2083_v7, %v2082_v2 }
0x2b1d   :  { %s4437_s15 = spop %3363  ;;  %v2085_v19 = vrot.slane %v2084_v55, 2 }
0x2b1e   :  { %v1480_v8 = vstv %s4437_s15 }
0x2b1f   :  { %v2086_v24 = vadd.f32 %v2085_v19, %v2084_v55  ;;  %v1481_v60 = vmul.f32 0.015625, %v1480_v8  ;;  %v2110_v8 = vstv %s2842_s9 }
0x2b21   :  { %s3366_s18 = spop %3365  ;;  %v2087_v1 = vrot.slane %v2086_v24, 1  ;;  %v1482_v33 = vadd.f32 1e-05, %v1481_v60 }
0x2b22   :  { %v1778_v9 = vstv %s3366_s18 }
0x2b23   :  { %v1779_v58 = vmul.f32 0.015625, %v1778_v9  ;;  %v2088_v4 = vadd.f32 %v2087_v1, %v2086_v24  ;;  %3524 = vrsqrt.f32 %v1482_v33 }
0x2b25   :  { %v4439_v13 = vsub.f32 %v1765_v48, %v1779_v58 }
0x2b27   :  { %v1781_v14 = vmul.f32 %v4439_v13, %v4439_v13 }
0x2b29   :  { %v1782_v53 = vsel %vm518_vm4, %v1781_v14, 0.0 }
0x2b2a   :  { %1783 = vadd.xlane.f32.xlu1 %v1782_v53 }
0x2b30   :  { %v3525_v63 = vpop.eup %3524 }
0x2b31   :  { %v1484_v16 = vmul.f32 %v3525_v63, %v4423_v22  ;;  %v2422_v63 = vstv %s2849_s28 }
0x2b33   :  { %v1487_v3 = vmul.f32 %v1486_v18, %v1484_v16 }
0x2b35   :  { %v1490_v12 = vadd.f32 %v1489_v43, %v1487_v3  ;;  %v2425_v3 = vstv %s2850_s29 }
0x2b6a   :  { %v2626_v54 = vpop.permute.xlu1 %2625 }
0x2b6b   :  { %v2628_v17 = vmul.f32 %v3521_v25, %v2626_v54 }
0x2b6d   :  { %2630 = vrot.lane.b32.xlu1 %v2628_v17, %s3725_s3 }
0x2bb3   :  { %v1784_v10 = vpop.xlane.xlu1 %1783 }
0x2bb4   :  { %v1785_v21 = vrot.slane %v1784_v10, 4 }
0x2bb6   :  { %v1786_v23 = vadd.f32 %v1785_v21, %v1784_v10 }
0x2bb8   :  { %v1787_v31 = vrot.slane %v1786_v23, 2 }
0x2bba   :  { %v1788_v34 = vadd.f32 %v1787_v31, %v1786_v23  ;;  %v856_v31 = vstv %s4409_s13  ;;  %s2836_s13 = sld [smem:[#allocation13 + $0x4]] }
0x2bbc   :  { %v1789_v35 = vrot.slane %v1788_v34, 1 }
0x2bbe   :  { %v1790_v36 = vadd.f32 %v1789_v35, %v1788_v34  ;;  %v857_v34 = vmul.f32 0.015625, %v856_v31 }
0x2bc0   :  { %3367 = vpush %v1790_v36  ;;  %v858_v35 = vadd.f32 1e-05, %v857_v34 }
0x2bc1   :  { %3369 = vpush %v2088_v4 }
0x2bc2   :  { %3526 = vrsqrt.f32 %v858_v35 }
0x2bdf   :  { %v2631_v37 = vpop.permute.xlu1 %2630 }
0x2be0   :  { %3347 = vmatmul.mubr.msk.f32.vlgmr.msra.gmra.mxu1 %vm229_vm2, %v2631_v37  ;;  %v1168_v37 = vstv %s4421_s14 }
0x2bf1   :  { %s4446_s19 = spop %3367 }
0x2bf2   :  { %s3370_s20 = spop %3369 }
0x2bf3   :  { %v2090_v39 = vstv %s3370_s20 }
0x2bf4   :  { %v2091_v41 = vmul.f32 0.015625, %v2090_v39 }
0x2bf6   :  { %v4448_v42 = vsub.f32 %v2077_v32, %v2091_v41 }
0x2bf8   :  { %v2093_v40 = vmul.f32 %v4448_v42, %v4448_v42 }
0x2bfa   :  { %v2094_v45 = vsel %vm518_vm4, %v2093_v40, 0.0  ;;  %v1169_v40 = vmul.f32 0.015625, %v1168_v37 }
0x2bfb   :  { %2095 = vadd.xlane.f32.xlu0 %v2094_v45 }
0x2bff   :  { %2393 = vadd.xlane.f32.xlu0 %v2392_v46 }
0x2c84   :  { %v2096_v47 = vpop.xlane.xlu0 %2095 }
0x2c85   :  { %v2097_v48 = vrot.slane %v2096_v47, 4 }
0x2c87   :  { %v2098_v50 = vadd.f32 %v2097_v48, %v2096_v47  ;;  %v1170_v48 = vadd.f32 1e-05, %v1169_v40 }
0x2c88   :  { %v2394_v51 = vpop.xlane.xlu0 %2393 }
0x2c89   :  { %v2099_v56 = vrot.slane %v2098_v50, 2  ;;  %v2395_v59 = vrot.slane %v2394_v51, 4 }
0x2c8b   :  { %v2396_v62 = vadd.f32 %v2395_v59, %v2394_v51  ;;  %v2100_v25 = vadd.f32 %v2099_v56, %v2098_v50  ;;  %v3527_v56 = vpop.eup %3526 }
0x2c8c   :  { %v860_v59 = vmul.f32 %v3527_v56, %v4398_v57 }
0x2c8d   :  { %v2397_v26 = vrot.slane %v2396_v62, 2  ;;  %v2101_v32 = vrot.slane %v2100_v25, 1 }
0x2c8f   :  { %v2102_v27 = vadd.f32 %v2101_v32, %v2100_v25  ;;  %v2398_v6 = vadd.f32 %v2397_v26, %v2396_v62  ;;  %v862_v25 = vstv %s2814_s25 }
0x2c90   :  { %v863_v26 = vmul.f32 %v862_v25, %v860_v59 }
0x2c91   :  { %3371 = vpush %v2102_v27  ;;  %v2399_v28 = vrot.slane %v2398_v6, 1 }
0x2c93   :  { %v2400_v0 = vadd.f32 %v2399_v28, %v2398_v6  ;;  %v865_v6 = vstv %s2815_s6 }
0x2c94   :  { %v866_v28 = vadd.f32 %v865_v6, %v863_v26 }
0x2c95   :  { %3373 = vpush %v2400_v0 }
0x2ca0   :  { %v2700_v29 = vpop.f32.mrf.mxu1 }
0x2ca1   :  { %v2701_v30 = vadd.f32 %v4348_v61, %v2700_v29  ;;  %v2113_v29 = vstv %s2843_s26 }
0x2ca2   :  { %v3348_v49 = vpop.f32.mrf.mxu1 }
0x2ca3   :  { %v2704_v38 = vsel %vm518_vm4, %v2701_v30, 0.0 }
0x2ca4   :  { %2705 = vadd.xlane.f32.xlu1 %v2704_v38 }
0x2cb5   :  { %2748 = vrot.lane.b32.xlu1 %v1490_v12, %s3726_s27 }
0x2cc2   :  { %s3372_s8 = spop %3371 }
0x2cc3   :  { %v2104_v1 = vstv %s3372_s8 }
0x2cc4   :  { %v2105_v36 = vmul.f32 0.015625, %v2104_v1 }
0x2cc6   :  { %s3374_s22 = spop %3373 }
0x2cc7   :  { %v2402_v5 = vstv %s3374_s22 }
0x2cc8   :  { %v2403_v11 = vmul.f32 0.015625, %v2402_v5 }
0x2cca   :  { %v4461_v61 = vsub.f32 %v2389_v44, %v2403_v11  ;;  %v2106_v44 = vadd.f32 1e-05, %v2105_v36 }
0x2ccc   :  { %v2405_v52 = vmul.f32 %v4461_v61, %v4461_v61  ;;  %3528 = vrsqrt.f32 %v2106_v44 }
0x2ccd   :  { %3530 = vrsqrt.f32 %v1170_v48 }
0x2cce   :  { %v2406_v9 = vsel %vm518_vm4, %v2405_v52, 0.0 }
0x2ccf   :  { %2407 = vadd.xlane.f32.xlu0 %v2406_v9 }
0x2cd9   :  { %v3529_v62 = vpop.eup %3528 }
0x2cda   :  { %v2108_v32 = vmul.f32 %v3529_v62, %v4448_v42  ;;  %v3531_v27 = vpop.eup %3530  ;;  %v1177_v42 = vstv %s2822_s1 }
0x2cdb   :  { %v1172_v0 = vmul.f32 %v3531_v27, %v4411_v15 }
0x2cdc   :  { %v2111_v60 = vmul.f32 %v2110_v8, %v2108_v32 }
0x2cde   :  { %v2114_v57 = vadd.f32 %v2113_v29, %v2111_v60 }
0x2d2d   :  { %v2706_v58 = vpop.xlane.xlu1 %2705 }
0x2d2e   :  { %v2707_v22 = vrot.slane %v2706_v58, 4 }
0x2d30   :  { %v2708_v14 = vadd.f32 %v2707_v22, %v2706_v58 }
0x2d32   :  { %v2709_v53 = vrot.slane %v2708_v14, 2 }
0x2d34   :  { %v2710_v7 = vadd.f32 %v2709_v53, %v2708_v14 }
0x2d36   :  { %v2711_v10 = vrot.slane %v2710_v7, 1 }
0x2d38   :  { %v2712_v24 = vadd.f32 %v2711_v10, %v2710_v7  ;;  %v1792_v10 = vstv %s4446_s19 }
0x2d58   :  { %v2408_v54 = vpop.xlane.xlu0 %2407 }
0x2d59   :  { %v2409_v17 = vrot.slane %v2408_v54, 4 }
0x2d5b   :  { %v2410_v2 = vadd.f32 %v2409_v17, %v2408_v54 }
0x2d5d   :  { %v2411_v55 = vrot.slane %v2410_v2, 2 }
0x2d5f   :  { %v2412_v19 = vadd.f32 %v2411_v55, %v2410_v2  ;;  %v2737_v2 = vstv %s2857_s30 }
0x2d61   :  { %v2413_v21 = vrot.slane %v2412_v19, 1 }
0x2d63   :  { %v2414_v23 = vadd.f32 %v2413_v21, %v2412_v19  ;;  %v544_v19 = vstv %s4395_s11 }
0x2d64   :  { %v545_v21 = vmul.f32 0.015625, %v544_v19 }
0x2d65   :  { %3375 = vpush %v2414_v23  ;;  %v1793_v23 = vmul.f32 0.015625, %v1792_v10 }
0x2d66   :  { %3377 = vpush %v2712_v24  ;;  %v546_v24 = vadd.f32 1e-05, %v545_v21 }
0x2d67   :  { %v1794_v31 = vadd.f32 1e-05, %v1793_v23 }
0x2d96   :  { %s3376_s23 = spop %3375 }
0x2d97   :  { %s3378_s24 = spop %3377  ;;  %v2416_v45 = vstv %s3376_s23 }
0x2d98   :  { %v2714_v4 = vstv %s3378_s24  ;;  %v2417_v50 = vmul.f32 0.015625, %v2416_v45  ;;  %v553_v45 = vstv %s552_s12 }
0x2d99   :  { %v2715_v39 = vmul.f32 0.015625, %v2714_v4 }
0x2d9a   :  { %v2418_v51 = vadd.f32 1e-05, %v2417_v50 }
0x2d9b   :  { %v4468_v41 = vsub.f32 %v2701_v30, %v2715_v39  ;;  %v1174_v30 = vstv %s2821_s16 }
0x2d9c   :  { %3532 = vrsqrt.f32 %v2418_v51  ;;  %v1175_v49 = vmul.f32 %v1174_v30, %v1172_v0 }
0x2d9d   :  { %v2717_v46 = vmul.f32 %v4468_v41, %v4468_v41 }
0x2d9e   :  { %v1178_v16 = vadd.f32 %v1177_v42, %v1175_v49 }
0x2d9f   :  { %v2718_v47 = vsel %vm518_vm4, %v2717_v46, 0.0 }
0x2da0   :  { %2719 = vadd.xlane.f32.xlu0 %v2718_v47  ;;  %v1801_v47 = vstv %s2836_s13 }
0x2da9   :  { %v3533_v33 = vpop.eup %3532 }
0x2daa   :  { %v2420_v38 = vmul.f32 %v3533_v33, %v4461_v61 }
0x2dac   :  { %v2423_v18 = vmul.f32 %v2422_v63, %v2420_v38 }
0x2dae   :  { %v2426_v15 = vadd.f32 %v2425_v3, %v2423_v18 }
0x2db6   :  { %2740 = vrot.lane.b32.xlu0 %v866_v28, %s3724_s17 }
0x2dba   :  { %2752 = vrot.lane.b32.xlu0 %v2114_v57, %s3724_s17  ;;  %s2856_s17 = sld [smem:[#allocation12 + $0x7]] }
0x2dbe   :  { %2744 = vrot.lane.b32.xlu0 %v1178_v16, %s3725_s3 }
0x2dc0   :  { %v2734_v54 = vstv %s2856_s17 }
0x2dc2   :  { %2756 = vrot.lane.b32.xlu0 %v2426_v15, %s3725_s3  ;;  %s549_s3 = sld [smem:[#allocation12]] }
0x2dc8   :  { %v550_v37 = vstv %s549_s3 }
0x2e29   :  { %v2720_v43 = vpop.xlane.xlu0 %2719 }
0x2e2a   :  { %v2721_v12 = vrot.slane %v2720_v43, 4 }
0x2e2c   :  { %v2722_v5 = vadd.f32 %v2721_v12, %v2720_v43 }
0x2e2d   :  { %v2741_v34 = vpop.permute.xlu0 %2740 }
0x2e2e   :  { %v2723_v11 = vrot.slane %v2722_v5, 2 }
0x2e30   :  { %v2724_v52 = vadd.f32 %v2723_v11, %v2722_v5 }
0x2e31   :  { %v2753_v35 = vpop.permute.xlu0 %2752 }
0x2e32   :  { %v2725_v9 = vrot.slane %v2724_v52, 1 }
0x2e34   :  { %v2726_v58 = vadd.f32 %v2725_v9, %v2724_v52 }
0x2e35   :  { %v2745_v40 = vpop.permute.xlu0 %2744 }
0x2e36   :  { %3379 = vpush %v2726_v58 }
0x2e39   :  { %v2757_v50 = vpop.permute.xlu0 %2756 }
0x2e67   :  { %s3380_s5 = spop %3379 }
0x2e68   :  { %v2728_v61 = vstv %s3380_s5 }
0x2e69   :  { %v2729_v22 = vmul.f32 0.015625, %v2728_v61 }
0x2e6b   :  { %v2730_v14 = vadd.f32 1e-05, %v2729_v22 }
0x2e6d   :  { %3534 = vrsqrt.f32 %v2730_v14 }
0x2e6e   :  { %3536 = vrsqrt.f32 %v546_v24 }
0x2e6f   :  { %3538 = vrsqrt.f32 %v1794_v31 }
0x2e7a   :  { %v3535_v53 = vpop.eup %3534 }
0x2e7b   :  { %v2732_v17 = vmul.f32 %v3535_v53, %v4468_v41  ;;  %v3537_v1 = vpop.eup %3536  ;;  %v1798_v41 = vstv %s2835_s7 }
0x2e7c   :  { %v3539_v36 = vpop.eup %3538  ;;  %v548_v4 = vmul.f32 %v3537_v1, %v4386_v20  ;;  %v2749_v20 = vpop.permute.xlu1 %2748 }
0x2e7d   :  { %v2735_v7 = vmul.f32 %v2734_v54, %v2732_v17  ;;  %v1796_v39 = vmul.f32 %v3539_v36, %v4439_v13 }
0x2e7e   :  { %v551_v44 = vmul.f32 %v550_v37, %v548_v4 }
0x2e7f   :  { %v2738_v55 = vadd.f32 %v2737_v2, %v2735_v7  ;;  %v1799_v46 = vmul.f32 %v1798_v41, %v1796_v39 }
0x2e80   :  { %v554_v48 = vadd.f32 %v553_v45, %v551_v44 }
0x2e81   :  { %2760 = vrot.lane.b32.xlu0 %v2738_v55, %s3726_s27  ;;  %v1802_v56 = vadd.f32 %v1801_v47, %v1799_v46  ;;  %s3727_s27 = smov [#allocation15]  }
0x2e82   :  { %v2763_v51 = vsel %vm229_vm2, %v554_v48, %v2741_v34  ;;  %s2788_s11 = sshll.u32 %s3727_s27, 4  ;;  %s2789_s11 = int_to_ptr.vmem [resolvable:$true] %s2788_s11 }
0x2e83   :  { %v2764_v59 = vsel %vm339_vm3, %v2763_v51, %v2745_v40  ;;  %v2767_v62 = vsel %vm229_vm2, %v1802_v56, %v2753_v35  ;;  %s3681_s4 = scalar_lea.vmem %s2789_s11, 64  ;;  %p3686_p8 = scmp.lt.s32.totalorder %s2789_s11, %s2789_s11 }
0x2e84   :  { %v2768_v13 = vsel %vm339_vm3, %v2767_v62, %v2757_v50  ;;  %v2766_v32 = vsel %vm2765_vm5, %v2764_v59, %v2749_v20  ;;  %p3682_p7 = scmp.ne.s32.totalorder %s2789_s11, %s3681_s4  ;;  %p3687_p9 = scmp.lt.s32.totalorder %s3681_s4, %s3681_s4 }
0x2e86   :  { %p3688_p10 = por %p3687_p9, %p3686_p8 }
0x2e88   :  { %p3689_p11 = pnand %p3688_p10, %p3682_p7 }
0x2ef3   :  { %v2761_v25 = vpop.permute.xlu0 %2760 }
0x2ef4   :  { %v2769_v26 = vsel %vm2765_vm5, %v2768_v13, %v2761_v25 }
0x2ef5   :  { %v2772_v27 = vcombine.low %v2766_v32, %v2769_v26 }
0x2ef7   :  { %2858 = vst.sshfl [vmem:[#allocation15] sm:$0x33 pattern:$0x76325410] %v2772_v27 }
0x2ef8   :  { %3692 = shalt.err (!%p3689_p11)
}
0x2ef9   :  { %2791 = dma.vmem_to_hbm [thread:$0]  %s2789_s11, 64, %s4504_s10, [#allocation4]  }
0x2efa   :  { %3711 = dma.done.wait [#allocation4], 64  }
0x2efb   :  { %3712 = vsyncadd [#allocation4], 4294967232 }
0x2efc   :  { %2795 = vsyncpa [#allocation3], 1 }
0x2efd   :  { %2796 = vsyncpa [#allocation7], 1 }
0x2efe   :  { %2797 = vsyncpa [#allocation10], 1 }
0x2eff   :  { %2798 = vsyncpa [#allocation4], 1 }
0x2f00   :  { %2799 = vsyncpa [#allocation5], 1 }
0x2f01   :  { %2800 = vsyncpa [#allocation14], 1 }

</bundles_post_ra>
